<compile_context>
chip_gen: v5e
topology: v5e:2x2
jax: 0.10.0
libtpu: 0.0.40
codegen_flags: <defaults>
</compile_context>

<pallas_src>
import functools

import jax
import jax.numpy as jnp
from jax import lax
from jax.experimental import pallas as pl
from jax.experimental.pallas import tpu as pltpu


# ---------------------------------------------------------------------------
# Fused kernel: 2x2 merge (via even/odd split) + LayerNorm(4C) + Linear(4C->2C)
# ---------------------------------------------------------------------------
def _merge_ln_linear_kernel(x_ref, w_ref, b_ref, o_ref, *, eps, inv_n):
    # x_ref: (tr, 2, Wh, 2C)   even/odd H-parity halves of each merged token
    # w_ref: (2, 2C, Nout)     gamma-folded weight, split into [top; bottom]
    # b_ref: (1, Nout)         beta @ W
    # o_ref: (tr, Wh, Nout)
    tr, _, wh, c2 = x_ref.shape
    xb = x_ref[...]
    e = xb[:, 0, :, :].reshape(tr * wh, c2).astype(jnp.float32)
    o = xb[:, 1, :, :].reshape(tr * wh, c2).astype(jnp.float32)

    # LayerNorm statistics over the full 4C (= both halves jointly).
    mean = (jnp.sum(e, axis=-1, keepdims=True)
            + jnp.sum(o, axis=-1, keepdims=True)) * inv_n
    de = e - mean
    do = o - mean
    var = (jnp.sum(de * de, axis=-1, keepdims=True)
           + jnp.sum(do * do, axis=-1, keepdims=True)) * inv_n
    inv = lax.rsqrt(var + eps)
    de = de * inv
    do = do * inv

    wf = w_ref[...]
    y = (jnp.dot(de, wf[0], preferred_element_type=jnp.float32)
         + jnp.dot(do, wf[1], preferred_element_type=jnp.float32)
         + b_ref[...].astype(jnp.float32))
    o_ref[...] = y.reshape(tr, wh, -1).astype(o_ref.dtype)


# ---------------------------------------------------------------------------
# Wrapper: only free reshapes (+ the reference's zero pad) outside the kernel
# ---------------------------------------------------------------------------
def downsample_forward(x, params, Z, H, W, *, eps=1e-5, tile_in_bytes=3 << 20):
    """x: (B, Z*H*W, C) float32  ->  (B, Z*(Hp//2)*(Wp//2), 2*C)."""
    B, N, C = x.shape
    assert N == Z * H * W, (N, Z, H, W)
    w, gamma, beta = params["w"], params["gamma"], params["beta"]   # (4C,2C),(4C,),(4C,)
    n_out = w.shape[1]
    c2 = 2 * C

    # Fold LayerNorm affine into the bias-free linear:
    #   (xn*gamma + beta) @ W = xn @ (gamma[:,None]*W) + beta @ W
    wg = (gamma[:, None] * w).reshape(2, c2, n_out)     # [even-half ; odd-half]
    b2 = (beta @ w).reshape(1, n_out)

    # Pad3D: zero-pad H and W up to even length (trailing edge).
    # TODO(synk): swap in the project's exact Pad3D if it pads differently.
    x = x.reshape(B, Z, H, W, C)
    ph, pw = H % 2, W % 2
    if ph or pw:
        x = jnp.pad(x, ((0, 0), (0, 0), (0, ph), (0, pw), (0, 0)))
    Hp, Wp = H + ph, W + pw
    Hh, Wh = Hp // 2, Wp // 2

    # Free row-major reshape: (B,Z,Hp,Wp,C) -> (B*Z*Hh, 2, Wh, 2C).
    # The last-axis 2C chunk is [w-even pixel C | w-odd pixel C]; the size-2
    # axis is the H parity, so concat(even,odd) == the torch 4C token.
    xv = x.reshape(B * Z * Hh, 2, Wh, c2)

    R = B * Z * Hh
    itemsize = jnp.dtype(x.dtype).itemsize
    row_in = 2 * Wh * c2 * itemsize
    row_out = Wh * n_out * 4
    tr = max(1, min(R, tile_in_bytes // max(1, row_in)))
    grid = (pl.cdiv(R, tr),)

    blk_in = tr * row_in
    w_bytes = (wg.size + b2.size) * 4
    vmem_limit = int(min(max(8 * blk_in + 2 * w_bytes + (8 << 20), 16 << 20),
                         48 << 20))

    out = pl.pallas_call(
        functools.partial(_merge_ln_linear_kernel, eps=eps, inv_n=1.0 / (2 * c2)),
        out_shape=jax.ShapeDtypeStruct((R, Wh, n_out), x.dtype),
        grid=grid,
        in_specs=[
            pl.BlockSpec((tr, 2, Wh, c2), lambda i: (i, 0, 0, 0)),
            pl.BlockSpec((2, c2, n_out), lambda i: (0, 0, 0)),   # fetched once
            pl.BlockSpec((1, n_out), lambda i: (0, 0)),          # fetched once
        ],
        out_specs=pl.BlockSpec((tr, Wh, n_out), lambda i: (i, 0, 0)),
        compiler_params=pltpu.CompilerParams(
            dimension_semantics=("parallel",),
            vmem_limit_bytes=vmem_limit,
        ),
    )(xv, wg, b2)

    return out.reshape(B, Z * Hh * Wh, n_out)


# ---------------------------------------------------------------------------
# Pure-JAX reference (mirrors the torch forward) for numerical validation
# ---------------------------------------------------------------------------
def downsample_ref(x, params, Z, H, W, eps=1e-5):
    B, _, C = x.shape
    x = x.reshape(B, Z, H, W, C)
    ph, pw = H % 2, W % 2
    x = jnp.pad(x, ((0, 0), (0, 0), (0, ph), (0, pw), (0, 0)))
    Hp, Wp = H + ph, W + pw
    x = x.reshape(B, Z, Hp // 2, 2, Wp // 2, 2, C)
    x = jnp.transpose(x, (0, 1, 2, 4, 3, 5, 6))
    x = x.reshape(B, Z * (Hp // 2) * (Wp // 2), 4 * C)
    mean = jnp.mean(x, axis=-1, keepdims=True)
    var = jnp.mean(jnp.square(x - mean), axis=-1, keepdims=True)
    xn = (x - mean) * lax.rsqrt(var + eps)
    y = xn * params["gamma"] + params["beta"]
    return y @ params["w"]


def init_params(key, dim):
    k1, k2, k3 = jax.random.split(key, 3)
    bound = 1.0 / (4 * dim) ** 0.5      # nn.Linear default U(-1/sqrt(fan_in), .)
    # Stored pre-transposed as (4*dim, 2*dim) so forward is x @ w.
    w = jax.random.uniform(k1, (4 * dim, 2 * dim), jnp.float32, -bound, bound)
    # Non-trivial affine to exercise the gamma/beta -> weight folding.
    gamma = 1.0 + 0.1 * jax.random.normal(k2, (4 * dim,), jnp.float32)
    beta = 0.1 * jax.random.normal(k3, (4 * dim,), jnp.float32)
    return {"w": w, "gamma": gamma, "beta": beta}


if __name__ == "__main__":
    # Small, lane-friendly demo shapes: dim=64 -> LN over 256, output 128.
    # H=9 is odd to exercise the Pad3D path (pads to 10).
    B, Z, H, W, dim = 2, 4, 9, 16, 64

    key = jax.random.PRNGKey(0)
    kx, kp = jax.random.split(key)
    x = jax.random.normal(kx, (B, Z * H * W, dim), dtype=jnp.float32)
    params = init_params(kp, dim)

    out = downsample_forward(x, params, Z, H, W)
    out = jax.block_until_ready(out)

    Hp, Wp = H + H % 2, W + W % 2
    expected = (B, Z * (Hp // 2) * (Wp // 2), 2 * dim)
    assert out.shape == expected, (out.shape, expected)
    assert jnp.isfinite(out).all()

    ref = downsample_ref(x, params, Z, H, W)
    max_err = float(jnp.max(jnp.abs(out - ref)))
    assert max_err < 2e-2, f"max abs error vs reference: {max_err}"

    print("KERNEL_OK")
</pallas_src>

<mosaic_0001>
module attributes {stable_mosaic.version = 11 : i64} {
  func.func @_merge_ln_linear_kernel(%arg0: i32, %arg1: memref<40x2x8x128xf32, #tpu.memory_space<vmem>>, %arg2: memref<2x128x128xf32, #tpu.memory_space<vmem>>, %arg3: memref<1x128xf32, #tpu.memory_space<vmem>>, %arg4: memref<40x8x128xf32, #tpu.memory_space<vmem>>) attributes {dimension_semantics = [#tpu.dimension_semantics<parallel>], iteration_bounds = array<i64: 1>, scalar_prefetch = 0 : i64, scratch_operands = 0 : i64, tpu.core_type = #tpu.core_type<tc>, window_params = [{transform_indices = @transform_0, window_bounds = array<i64: 40, 2, 8, 128>}, {pipeline_mode = #tpu.pipeline_mode<synchronous>, transform_indices = @transform_1, window_bounds = array<i64: 2, 128, 128>}, {pipeline_mode = #tpu.pipeline_mode<synchronous>, transform_indices = @transform_2, window_bounds = array<i64: 1, 128>}, {transform_indices = @transform_3, window_bounds = array<i64: 40, 8, 128>}]} {
    %c0 = arith.constant 0 : index
    %c0_0 = arith.constant 0 : index
    %c0_1 = arith.constant 0 : index
    %c0_2 = arith.constant 0 : index
    %0 = vector.load %arg1[%c0, %c0_0, %c0_1, %c0_2] : memref<40x2x8x128xf32, #tpu.memory_space<vmem>>, vector<40x2x8x128xf32>
    %1 = vector.extract_strided_slice %0 {offsets = [0, 0, 0, 0], sizes = [40, 1, 8, 128], strides = [1, 1, 1, 1]} : vector<40x2x8x128xf32> to vector<40x1x8x128xf32>
    %2 = vector.shape_cast %1 : vector<40x1x8x128xf32> to vector<40x8x128xf32>
    %3 = vector.shape_cast %2 : vector<40x8x128xf32> to vector<320x128xf32>
    %4 = vector.extract_strided_slice %0 {offsets = [0, 1, 0, 0], sizes = [40, 1, 8, 128], strides = [1, 1, 1, 1]} : vector<40x2x8x128xf32> to vector<40x1x8x128xf32>
    %5 = vector.shape_cast %4 : vector<40x1x8x128xf32> to vector<40x8x128xf32>
    %6 = vector.shape_cast %5 : vector<40x8x128xf32> to vector<320x128xf32>
    %cst = arith.constant dense<0.000000e+00> : vector<320xf32>
    %7 = vector.multi_reduction <add>, %3, %cst [1] : vector<320x128xf32> to vector<320xf32>
    %8 = vector.shape_cast %7 : vector<320xf32> to vector<320x1xf32>
    %cst_3 = arith.constant dense<0.000000e+00> : vector<320xf32>
    %9 = vector.multi_reduction <add>, %6, %cst_3 [1] : vector<320x128xf32> to vector<320xf32>
    %10 = vector.shape_cast %9 : vector<320xf32> to vector<320x1xf32>
    %11 = arith.addf %8, %10 : vector<320x1xf32>
    %cst_4 = arith.constant 3.906250e-03 : f32
    %12 = vector.broadcast %cst_4 : f32 to vector<320x1xf32>
    %13 = arith.mulf %11, %12 : vector<320x1xf32>
    %14 = vector.broadcast %13 : vector<320x1xf32> to vector<320x128xf32>
    %15 = arith.subf %3, %14 : vector<320x128xf32>
    %16 = vector.broadcast %13 : vector<320x1xf32> to vector<320x128xf32>
    %17 = arith.subf %6, %16 : vector<320x128xf32>
    %18 = arith.mulf %15, %15 : vector<320x128xf32>
    %cst_5 = arith.constant dense<0.000000e+00> : vector<320xf32>
    %19 = vector.multi_reduction <add>, %18, %cst_5 [1] : vector<320x128xf32> to vector<320xf32>
    %20 = vector.shape_cast %19 : vector<320xf32> to vector<320x1xf32>
    %21 = arith.mulf %17, %17 : vector<320x128xf32>
    %cst_6 = arith.constant dense<0.000000e+00> : vector<320xf32>
    %22 = vector.multi_reduction <add>, %21, %cst_6 [1] : vector<320x128xf32> to vector<320xf32>
    %23 = vector.shape_cast %22 : vector<320xf32> to vector<320x1xf32>
    %24 = arith.addf %20, %23 : vector<320x1xf32>
    %cst_7 = arith.constant 3.906250e-03 : f32
    %25 = vector.broadcast %cst_7 : f32 to vector<320x1xf32>
    %26 = arith.mulf %24, %25 : vector<320x1xf32>
    %cst_8 = arith.constant 9.99999974E-6 : f32
    %27 = vector.broadcast %cst_8 : f32 to vector<320x1xf32>
    %28 = arith.addf %26, %27 : vector<320x1xf32>
    %29 = math.rsqrt %28 : vector<320x1xf32>
    %30 = vector.broadcast %29 : vector<320x1xf32> to vector<320x128xf32>
    %31 = arith.mulf %15, %30 : vector<320x128xf32>
    %32 = vector.broadcast %29 : vector<320x1xf32> to vector<320x128xf32>
    %33 = arith.mulf %17, %32 : vector<320x128xf32>
    %c0_9 = arith.constant 0 : index
    %c0_10 = arith.constant 0 : index
    %c0_11 = arith.constant 0 : index
    %34 = vector.load %arg2[%c0_9, %c0_10, %c0_11] : memref<2x128x128xf32, #tpu.memory_space<vmem>>, vector<2x128x128xf32>
    %35 = vector.extract_strided_slice %34 {offsets = [0, 0, 0], sizes = [1, 128, 128], strides = [1, 1, 1]} : vector<2x128x128xf32> to vector<1x128x128xf32>
    %36 = vector.shape_cast %35 : vector<1x128x128xf32> to vector<128x128xf32>
    %cst_12 = arith.constant dense<0.000000e+00> : vector<320x128xf32>
    %37 = tpu.matmul %31, %36, %cst_12 {dimension_numbers = #tpu.dot_dimension_numbers<[1], [0], [0], [1], [0, 0, 1, 1], [], []>} : vector<320x128xf32>, vector<128x128xf32>, vector<320x128xf32> -> vector<320x128xf32>
    %38 = vector.extract_strided_slice %34 {offsets = [1, 0, 0], sizes = [1, 128, 128], strides = [1, 1, 1]} : vector<2x128x128xf32> to vector<1x128x128xf32>
    %39 = vector.shape_cast %38 : vector<1x128x128xf32> to vector<128x128xf32>
    %cst_13 = arith.constant dense<0.000000e+00> : vector<320x128xf32>
    %40 = tpu.matmul %33, %39, %cst_13 {dimension_numbers = #tpu.dot_dimension_numbers<[1], [0], [0], [1], [0, 0, 1, 1], [], []>} : vector<320x128xf32>, vector<128x128xf32>, vector<320x128xf32> -> vector<320x128xf32>
    %41 = arith.addf %37, %40 : vector<320x128xf32>
    %c0_14 = arith.constant 0 : index
    %c0_15 = arith.constant 0 : index
    %42 = vector.load %arg3[%c0_14, %c0_15] : memref<1x128xf32, #tpu.memory_space<vmem>>, vector<1x128xf32>
    %43 = vector.broadcast %42 : vector<1x128xf32> to vector<320x128xf32>
    %44 = arith.addf %41, %43 : vector<320x128xf32>
    %45 = vector.shape_cast %44 : vector<320x128xf32> to vector<40x8x128xf32>
    %c0_16 = arith.constant 0 : index
    %c0_17 = arith.constant 0 : index
    %c0_18 = arith.constant 0 : index
    %46 = vector.load %arg4[%c0_16, %c0_17, %c0_18] : memref<40x8x128xf32, #tpu.memory_space<vmem>>, vector<40x8x128xf32>
    tpu.vector_store %arg4[%c0_16, %c0_17, %c0_18], %45 {strides = array<i32>} : memref<40x8x128xf32, #tpu.memory_space<vmem>>, vector<40x8x128xf32>,
    return
  }
  func.func @transform_0(%arg0: i32) -> (i32, i32, i32, i32) {
    %c0_i32 = arith.constant 0 : i32
    %c0_i32_0 = arith.constant 0 : i32
    %c0_i32_1 = arith.constant 0 : i32
    %c0_i32_2 = arith.constant 0 : i32
    return %arg0, %c0_i32, %c0_i32_0, %c0_i32_1 : i32, i32, i32, i32
  }
  func.func @transform_1(%arg0: i32) -> (i32, i32, i32) {
    %c0_i32 = arith.constant 0 : i32
    %c0_i32_0 = arith.constant 0 : i32
    %c0_i32_1 = arith.constant 0 : i32
    %c0_i32_2 = arith.constant 0 : i32
    return %c0_i32, %c0_i32_0, %c0_i32_1 : i32, i32, i32
  }
  func.func @transform_2(%arg0: i32) -> (i32, i32) {
    %c0_i32 = arith.constant 0 : i32
    %c0_i32_0 = arith.constant 0 : i32
    %c0_i32_1 = arith.constant 0 : i32
    return %c0_i32, %c0_i32_0 : i32, i32
  }
  func.func @transform_3(%arg0: i32) -> (i32, i32, i32) {
    %c0_i32 = arith.constant 0 : i32
    %c0_i32_0 = arith.constant 0 : i32
    %c0_i32_1 = arith.constant 0 : i32
    return %arg0, %c0_i32, %c0_i32_0 : i32, i32, i32
  }
}

</mosaic_0001>

<bundles_post_ra>
// kernel: tpu_custom_call.1
= control target key start
LH: loop header
LB: loop body
LE: loop exit
PB: predicated region body
PF: predicated region fallthrough
CT: control target
= control target key end

     0   :  { %8 = vsyncpa [#allocation3], 0  ;;  %s2887_s0 = inlined_call_operand.hbm [shape: f32[40,2,8,128], index: 0, kind: input, shape index: {}]   ;;  %s2888_s1 = inlined_call_operand.hbm [shape: f32[2,128,128], index: 1, kind: input, shape index: {}]   ;;  %s2889_s2 = inlined_call_operand.vmem [shape: f32[1,128], index: 2, kind: input, shape index: {}]   ;;  %s2890_s3 = inlined_call_operand.hbm [shape: f32[40,8,128], index: 3, kind: output, shape index: {}]  }
   0x1   :  { %9 = vsyncpa [#allocation6], 0 }
   0x2   :  { %10 = vsyncpa [#allocation4], 0  ;;  %s15_s14 = sshll.u32 %s2887_s0, 4  ;;  %s1907_s15 = smov [#allocation2]   ;;  %s16_s14 = int_to_ptr.hbm [resolvable:$true] %s15_s14 }
   0x3   :  { %s17_s16 = sshll.u32 %s1907_s15, 4  ;;  %s28_s19 = sshll.u32 %s2888_s1, 4  ;;  %s18_s16 = int_to_ptr.vmem [resolvable:$true] %s17_s16  ;;  %s29_s19 = int_to_ptr.hbm [resolvable:$true] %s28_s19 }
   0x4   :  { %s1908_s20 = smov 128   ;;  %s1909_s21 = smov 8  }
   0x5   :  { %23 = dma.hbm_to_vmem [thread:$0]  %s16_s14, 10240, %s18_s16, [#allocation3], %s1908_s20, %s1908_s20, %s1909_s21  }
   0x6   :  { %s1910_s22 = smov [#allocation5]  }
   0x7   :  { %s30_s23 = sshll.u32 %s1910_s22, 4  ;;  %s31_s23 = int_to_ptr.vmem [resolvable:$true] %s30_s23 }
   0x8   :  { %36 = dma.hbm_to_vmem [thread:$0]  %s29_s19, 4096, %s31_s23, [#allocation6], %s1908_s20, %s1908_s20, %s1909_s21  }
   0x9   :  { %1901 = dma.done.wait [#allocation3], 10240  }
   0xa   :  { %1902 = vsyncadd [#allocation3], 4294957056 }
   0xb   :  { %1903 = dma.done.wait [#allocation6], 4096  }
   0xc   :  { %1904 = vsyncadd [#allocation6], 4294963200  ;;  %v1944_v0 = vld [vmem:[#allocation2 + $0x40] sm:$0xff]  ;;  %v1953_v3 = vld [vmem:[#allocation2 + $0x50] sm:$0xff]  ;;  %s1683_s29 = sshll.u32 %s2890_s3, 4  ;;  %s1684_s29 = int_to_ptr.hbm [resolvable:$true] %s1683_s29 }
   0xd   :  { %v1946_v1 = vld [vmem:[#allocation2 + $0x20] sm:$0xff]  ;;  %135 = vadd.xlane.f32.xlu2 %v1944_v0  ;;  %v1955_v4 = vld [vmem:[#allocation2 + $0x30] sm:$0xff]  ;;  %v1986_v24 = vld [vmem:[#allocation2 + $0x148] sm:$0xff] }
   0xe   :  { %v1948_v2 = vld [vmem:[#allocation2] sm:$0xff]  ;;  %131 = vadd.xlane.f32.xlu1 %v1946_v1  ;;  %v1957_v5 = vld [vmem:[#allocation2 + $0x10] sm:$0xff]  ;;  %v1995_v27 = vld [vmem:[#allocation2 + $0x158] sm:$0xff] }
   0xf   :  { %127 = vadd.xlane.f32.xlu0 %v1948_v2  ;;  %v1962_v6 = vld [vmem:[#allocation2 + $0x80] sm:$0xff]  ;;  %v1964_v7 = vld [vmem:[#allocation2 + $0x70] sm:$0xff]  ;;  %v1997_v28 = vld [vmem:[#allocation2 + $0x8] sm:$0xff] }
  0x10   :  { %v1966_v8 = vld [vmem:[#allocation2 + $0x60] sm:$0xff]  ;;  %v69_v9 = vld [vmem:[#allocation2 + $0xb0] sm:$0xff]  ;;  %v2004_v30 = vld [vmem:[#allocation2 + $0x168] sm:$0xff] }
  0x11   :  { %v67_v10 = vld [vmem:[#allocation2 + $0xa0] sm:$0xff]  ;;  %v1971_v11 = vld [vmem:[#allocation2 + $0x90] sm:$0xff]  ;;  %v2006_v31 = vld [vmem:[#allocation2 + $0x18] sm:$0xff] }
  0x12   :  { %2905 = vst [vmem:[#allocation11_spill] sm:$0xff] %v1971_v11  ;;  %v75_v12 = vld [vmem:[#allocation2 + $0xe0] sm:$0xff]  ;;  %v73_v13 = vld [vmem:[#allocation2 + $0xd0] sm:$0xff]  ;;  %v2015_v34 = vld [vmem:[#allocation2 + $0x178] sm:$0xff] }
  0x13   :  { %v71_v14 = vld [vmem:[#allocation2 + $0xc0] sm:$0xff]  ;;  %v81_v15 = vld [vmem:[#allocation2 + $0x110] sm:$0xff]  ;;  %v2017_v35 = vld [vmem:[#allocation2 + $0x28] sm:$0xff] }
  0x14   :  { %v79_v16 = vld [vmem:[#allocation2 + $0x100] sm:$0xff]  ;;  %v77_v17 = vld [vmem:[#allocation2 + $0xf0] sm:$0xff]  ;;  %v2024_v37 = vld [vmem:[#allocation2 + $0x188] sm:$0xff] }
  0x15   :  { %137 = vadd.xlane.f32.xlu2 %v1953_v3  ;;  %v1974_v18 = vld [vmem:[#allocation2 + $0x140] sm:$0xff]  ;;  %v85_v19 = vld [vmem:[#allocation2 + $0x130] sm:$0xff]  ;;  %v2026_v38 = vld [vmem:[#allocation2 + $0x38] sm:$0xff] }
  0x16   :  { %133 = vadd.xlane.f32.xlu1 %v1955_v4  ;;  %v83_v20 = vld [vmem:[#allocation2 + $0x120] sm:$0xff]  ;;  %v1977_v21 = vld [vmem:[#allocation2 + $0x170] sm:$0xff]  ;;  %v2031_v39 = vld [vmem:[#allocation2 + $0x58] sm:$0xff] }
  0x17   :  { %129 = vadd.xlane.f32.xlu0 %v1957_v5  ;;  %v1979_v22 = vld [vmem:[#allocation2 + $0x160] sm:$0xff]  ;;  %v1981_v23 = vld [vmem:[#allocation2 + $0x150] sm:$0xff]  ;;  %v2033_v40 = vld [vmem:[#allocation2 + $0x198] sm:$0xff] }
  0x18   :  { %v1988_v25 = vld [vmem:[#allocation2 + $0x190] sm:$0xff]  ;;  %v1990_v26 = vld [vmem:[#allocation2 + $0x180] sm:$0xff]  ;;  %v2035_v41 = vld [vmem:[#allocation2 + $0x48] sm:$0xff] }
  0x19   :  { %v1999_v29 = vld [vmem:[#allocation2 + $0x1a0] sm:$0xff]  ;;  %v2008_v32 = vld [vmem:[#allocation2 + $0x1b0] sm:$0xff]  ;;  %v2040_v42 = vld [vmem:[#allocation2 + $0x1a8] sm:$0xff] }
  0x1a   :  { %v2013_v33 = vld [vmem:[#allocation2 + $0x1c0] sm:$0xff]  ;;  %v2022_v36 = vld [vmem:[#allocation2 + $0x1d0] sm:$0xff]  ;;  %v2047_v46 = vld [vmem:[#allocation2 + $0x68] sm:$0xff] }
  0x1b   :  { %v2054_v50 = vld [vmem:[#allocation2 + $0x1b8] sm:$0xff]  ;;  %v2072_v58 = vld [vmem:[#allocation2 + $0x1c8] sm:$0xff] }
  0x1c   :  { %v2063_v54 = vld [vmem:[#allocation2 + $0x78] sm:$0xff]  ;;  %v2081_v62 = vld [vmem:[#allocation2 + $0x88] sm:$0xff] }
  0x1d   :  { %143 = vadd.xlane.f32.xlu2 %v1962_v6 }
  0x1e   :  { %141 = vadd.xlane.f32.xlu1 %v1964_v7 }
  0x1f   :  { %139 = vadd.xlane.f32.xlu0 %v1966_v8 }
  0x25   :  { %149 = vadd.xlane.f32.xlu2 %v69_v9 }
  0x26   :  { %147 = vadd.xlane.f32.xlu1 %v67_v10 }
  0x27   :  { %145 = vadd.xlane.f32.xlu0 %v1971_v11 }
  0x2d   :  { %155 = vadd.xlane.f32.xlu2 %v75_v12  ;;  %v2090_v12 = vld [vmem:[#allocation2 + $0x1d8] sm:$0xff] }
  0x2e   :  { %153 = vadd.xlane.f32.xlu1 %v73_v13  ;;  %2915 = vst [vmem:[#allocation21_spill] sm:$0xff] %v2090_v12 }
  0x2f   :  { %151 = vadd.xlane.f32.xlu0 %v71_v14 }
  0x35   :  { %161 = vadd.xlane.f32.xlu2 %v81_v15 }
  0x36   :  { %159 = vadd.xlane.f32.xlu1 %v79_v16  ;;  %v2097_v16 = vld [vmem:[#allocation2 + $0x98] sm:$0xff] }
  0x37   :  { %157 = vadd.xlane.f32.xlu0 %v77_v17  ;;  %2918 = vst [vmem:[#allocation24_spill] sm:$0xff] %v2097_v16 }
  0x3d   :  { %167 = vadd.xlane.f32.xlu2 %v1974_v18 }
  0x3e   :  { %165 = vadd.xlane.f32.xlu1 %v85_v19 }
  0x3f   :  { %163 = vadd.xlane.f32.xlu0 %v83_v20 }
  0x45   :  { %173 = vadd.xlane.f32.xlu2 %v1977_v21 }
  0x46   :  { %171 = vadd.xlane.f32.xlu1 %v1979_v22 }
  0x47   :  { %169 = vadd.xlane.f32.xlu0 %v1981_v23 }
  0x4d   :  { %247 = vadd.xlane.f32.xlu2 %v1986_v24 }
  0x4e   :  { %177 = vadd.xlane.f32.xlu1 %v1988_v25 }
  0x4f   :  { %175 = vadd.xlane.f32.xlu0 %v1990_v26 }
  0x55   :  { %249 = vadd.xlane.f32.xlu2 %v1995_v27 }
  0x56   :  { %207 = vadd.xlane.f32.xlu1 %v1997_v28 }
  0x57   :  { %179 = vadd.xlane.f32.xlu0 %v1999_v29 }
  0x5d   :  { %251 = vadd.xlane.f32.xlu2 %v2004_v30 }
  0x5e   :  { %209 = vadd.xlane.f32.xlu1 %v2006_v31 }
  0x5f   :  { %181 = vadd.xlane.f32.xlu0 %v2008_v32 }
  0x65   :  { %183 = vadd.xlane.f32.xlu2 %v2013_v33 }
  0x66   :  { %253 = vadd.xlane.f32.xlu1 %v2015_v34 }
  0x67   :  { %211 = vadd.xlane.f32.xlu0 %v2017_v35 }
  0x6d   :  { %185 = vadd.xlane.f32.xlu2 %v2022_v36 }
  0x6e   :  { %255 = vadd.xlane.f32.xlu1 %v2024_v37 }
  0x6f   :  { %213 = vadd.xlane.f32.xlu0 %v2026_v38 }
  0x75   :  { %217 = vadd.xlane.f32.xlu2 %v2031_v39 }
  0x76   :  { %257 = vadd.xlane.f32.xlu1 %v2033_v40 }
  0x77   :  { %215 = vadd.xlane.f32.xlu0 %v2035_v41 }
  0x7f   :  { %259 = vadd.xlane.f32.xlu0 %v2040_v42 }
  0x80   :  { %v2043_v43 = vpop.xlane.xlu2 %135 }
  0x81   :  { %v2045_v44 = vpop.xlane.xlu1 %131 }
  0x82   :  { %v128_v45 = vpop.xlane.xlu0 %127 }
  0x87   :  { %219 = vadd.xlane.f32.xlu0 %v2047_v46 }
  0x88   :  { %v2050_v47 = vpop.xlane.xlu2 %137 }
  0x89   :  { %v2052_v48 = vpop.xlane.xlu1 %133 }
  0x8a   :  { %v130_v49 = vpop.xlane.xlu0 %129 }
  0x8f   :  { %261 = vadd.xlane.f32.xlu0 %v2054_v50 }
  0x90   :  { %v2057_v51 = vpop.xlane.xlu2 %143 }
  0x91   :  { %v2059_v52 = vpop.xlane.xlu1 %141 }
  0x92   :  { %v2061_v53 = vpop.xlane.xlu0 %139 }
  0x97   :  { %221 = vadd.xlane.f32.xlu0 %v2063_v54 }
  0x98   :  { %v2066_v55 = vpop.xlane.xlu2 %149 }
  0x99   :  { %2906 = vst [vmem:[#allocation12_spill] sm:$0xff] %v2066_v55  ;;  %v2068_v56 = vpop.xlane.xlu1 %147 }
  0x9a   :  { %2907 = vst [vmem:[#allocation13_spill] sm:$0xff] %v2068_v56  ;;  %v2070_v57 = vpop.xlane.xlu0 %145 }
  0x9b   :  { %2908 = vst [vmem:[#allocation14_spill] sm:$0xff] %v2070_v57 }
  0x9f   :  { %263 = vadd.xlane.f32.xlu0 %v2072_v58 }
  0xa0   :  { %v2075_v59 = vpop.xlane.xlu2 %155 }
  0xa1   :  { %2909 = vst [vmem:[#allocation15_spill] sm:$0xff] %v2075_v59  ;;  %v2077_v60 = vpop.xlane.xlu1 %153 }
  0xa2   :  { %2910 = vst [vmem:[#allocation16_spill] sm:$0xff] %v2077_v60  ;;  %v2079_v61 = vpop.xlane.xlu0 %151  ;;  %v2104_v60 = vld [vmem:[#allocation2 + $0x1e0] sm:$0xff] }
  0xa3   :  { %2911 = vst [vmem:[#allocation17_spill] sm:$0xff] %v2079_v61 }
  0xa4   :  { %2919 = vst [vmem:[#allocation25_spill] sm:$0xff] %v2104_v60 }
  0xa7   :  { %223 = vadd.xlane.f32.xlu0 %v2081_v62 }
  0xa8   :  { %v2084_v63 = vpop.xlane.xlu2 %161 }
  0xa9   :  { %2912 = vst [vmem:[#allocation18_spill] sm:$0xff] %v2084_v63  ;;  %v2086_v9 = vpop.xlane.xlu1 %159 }
  0xaa   :  { %2913 = vst [vmem:[#allocation19_spill] sm:$0xff] %v2086_v9  ;;  %v2088_v10 = vpop.xlane.xlu0 %157 }
  0xab   :  { %2914 = vst [vmem:[#allocation20_spill] sm:$0xff] %v2088_v10 }
  0xaf   :  { %265 = vadd.xlane.f32.xlu0 %v2090_v12 }
  0xb0   :  { %v168_v13 = vpop.xlane.xlu2 %167 }
  0xb1   :  { %v2093_v14 = vpop.xlane.xlu1 %165 }
  0xb2   :  { %2916 = vst [vmem:[#allocation22_spill] sm:$0xff] %v2093_v14  ;;  %v2095_v15 = vpop.xlane.xlu0 %163 }
  0xb3   :  { %2917 = vst [vmem:[#allocation23_spill] sm:$0xff] %v2095_v15 }
  0xb7   :  { %225 = vadd.xlane.f32.xlu0 %v2097_v16 }
  0xb8   :  { %v2100_v17 = vpop.xlane.xlu2 %173 }
  0xb9   :  { %v172_v19 = vpop.xlane.xlu1 %171 }
  0xba   :  { %v170_v20 = vpop.xlane.xlu0 %169 }
  0xbf   :  { %187 = vadd.xlane.f32.xlu0 %v2104_v60 }
  0xc0   :  { %v248_v63 = vpop.xlane.xlu2 %247 }
  0xc1   :  { %v2102_v9 = vpop.xlane.xlu1 %177  ;;  %v307_v10 = vadd.f32 %v248_v63, %v168_v13 }
  0xc2   :  { %v176_v59 = vpop.xlane.xlu0 %175 }
  0xc3   :  { %v347_v14 = vmul.f32 0.00390625, %v307_v10 }
  0xc5   :  { %v2108_v15 = vsub.f32 %v1974_v18, %v347_v14  ;;  %v2111_v61 = vsub.f32 %v1986_v24, %v347_v14 }
  0xc7   :  { %v587_v55 = vmul.f32 %v2111_v61, %v2111_v61  ;;  %v467_v56 = vmul.f32 %v2108_v15, %v2108_v15 }
  0xc8   :  { %v250_v16 = vpop.xlane.xlu2 %249 }
  0xc9   :  { %v208_v63 = vpop.xlane.xlu1 %207  ;;  %647 = vadd.xlane.f32.xlu2 %v587_v55  ;;  %527 = vadd.xlane.f32.xlu1 %v467_v56  ;;  %v308_v10 = vadd.f32 %v250_v16, %v170_v20 }
  0xca   :  { %v287_v13 = vadd.f32 %v208_v63, %v128_v45  ;;  %v2117_v11 = vpop.xlane.xlu0 %179 }
  0xcb   :  { %v348_v14 = vmul.f32 0.00390625, %v308_v10 }
  0xcc   :  { %v327_v60 = vmul.f32 0.00390625, %v287_v13 }
  0xcd   :  { %v2132_v55 = vsub.f32 %v1981_v23, %v348_v14 }
  0xce   :  { %v2120_v18 = vsub.f32 %v1948_v2, %v327_v60  ;;  %v2123_v24 = vsub.f32 %v1997_v28, %v327_v60  ;;  %v2135_v2 = vsub.f32 %v1995_v27, %v348_v14 }
  0xcf   :  { %2920 = vst [vmem:[#allocation26_spill] sm:$0xff] %v2132_v55  ;;  %v468_v20 = vmul.f32 %v2132_v55, %v2132_v55 }
  0xd0   :  { %v567_v57 = vmul.f32 %v2123_v24, %v2123_v24  ;;  %v447_v12 = vmul.f32 %v2120_v18, %v2120_v18  ;;  %v252_v28 = vpop.xlane.xlu2 %251  ;;  %v588_v16 = vmul.f32 %v2135_v2, %v2135_v2 }
  0xd1   :  { %v210_v45 = vpop.xlane.xlu1 %209 }
  0xd2   :  { %v2129_v63 = vpop.xlane.xlu0 %181  ;;  %607 = vadd.xlane.f32.xlu2 %v567_v57  ;;  %487 = vadd.xlane.f32.xlu1 %v447_v12  ;;  %v288_v56 = vadd.f32 %v210_v45, %v130_v49  ;;  %v309_v57 = vadd.f32 %v252_v28, %v172_v19 }
  0xd4   :  { %v328_v60 = vmul.f32 0.00390625, %v288_v56  ;;  %v349_v49 = vmul.f32 0.00390625, %v309_v57 }
  0xd6   :  { %v2142_v23 = vsub.f32 %v1957_v5, %v328_v60  ;;  %v2145_v27 = vsub.f32 %v2006_v31, %v328_v60  ;;  %v2154_v5 = vsub.f32 %v1979_v22, %v349_v49  ;;  %v2157_v31 = vsub.f32 %v2004_v30, %v349_v49 }
  0xd8   :  { %v2147_v12 = vpop.xlane.xlu2 %183  ;;  %v568_v14 = vmul.f32 %v2145_v27, %v2145_v27  ;;  %v448_v45 = vmul.f32 %v2142_v23, %v2142_v23 }
  0xd9   :  { %v254_v13 = vpop.xlane.xlu1 %253 }
  0xda   :  { %v212_v10 = vpop.xlane.xlu0 %211  ;;  %649 = vadd.xlane.f32.xlu2 %v588_v16  ;;  %529 = vadd.xlane.f32.xlu1 %v468_v20 }
  0xdb   :  { %v289_v19 = vadd.f32 %v212_v10, %v2045_v44 }
  0xdd   :  { %v329_v20 = vmul.f32 0.00390625, %v289_v19 }
  0xdf   :  { %v2177_v10 = vsub.f32 %v2017_v35, %v329_v20 }
  0xe0   :  { %v2163_v57 = vpop.xlane.xlu2 %185 }
  0xe1   :  { %v256_v56 = vpop.xlane.xlu1 %255 }
  0xe2   :  { %v311_v55 = vadd.f32 %v256_v56, %v176_v59  ;;  %v214_v16 = vpop.xlane.xlu0 %213  ;;  %609 = vadd.xlane.f32.xlu2 %v568_v14  ;;  %489 = vadd.xlane.f32.xlu1 %v448_v45  ;;  %v589_v59 = vmul.f32 %v2157_v31, %v2157_v31  ;;  %v469_v14 = vmul.f32 %v2154_v5, %v2154_v5 }
  0xe4   :  { %v351_v28 = vmul.f32 0.00390625, %v311_v55  ;;  %v2174_v55 = vsub.f32 %v1946_v1, %v329_v20 }
  0xe6   :  { %v2161_v60 = vsub.f32 %v2024_v37, %v351_v28  ;;  %v310_v37 = vadd.f32 %v254_v13, %v2100_v17  ;;  %v290_v13 = vadd.f32 %v214_v16, %v2052_v48 }
  0xe8   :  { %2921 = vst [vmem:[#allocation27_spill] sm:$0xff] %v2161_v60  ;;  %v591_v22 = vmul.f32 %v2161_v60, %v2161_v60  ;;  %v350_v60 = vmul.f32 0.00390625, %v310_v37  ;;  %v218_v35 = vpop.xlane.xlu2 %217 }
  0xe9   :  { %v258_v30 = vpop.xlane.xlu1 %257  ;;  %v292_v20 = vadd.f32 %v218_v35, %v2050_v47  ;;  %v2245_v35 = vld [vmem:[#allocation2 + $0xa8] sm:$0xff] }
  0xea   :  { %v216_v49 = vpop.xlane.xlu0 %215  ;;  %651 = vadd.xlane.f32.xlu2 %v589_v59  ;;  %531 = vadd.xlane.f32.xlu1 %v469_v14  ;;  %v312_v45 = vadd.f32 %v258_v30, %v2102_v9  ;;  %v569_v59 = vmul.f32 %v2177_v10, %v2177_v10  ;;  %v2192_v9 = vsub.f32 %v1977_v21, %v350_v60 }
  0xeb   :  { %v291_v44 = vadd.f32 %v216_v49, %v2043_v43  ;;  %655 = vadd.xlane.f32.xlu0 %v591_v22  ;;  %v449_v43 = vmul.f32 %v2174_v55, %v2174_v55  ;;  %v330_v22 = vmul.f32 0.00390625, %v290_v13  ;;  %v1318_v13 = vld [vmem:[#allocation5 + $0xf8] sm:$0xff] }
  0xec   :  { %v2187_v17 = vmul.f32 0.00390625, %v312_v45  ;;  %v470_v21 = vmul.f32 %v2192_v9, %v2192_v9  ;;  %1697 = vmatpush.msra.mxu2 %v1318_v13  ;;  %1319 = vmatpush.msra.mxu0 %v1318_v13  ;;  %v1315_v13 = vld [vmem:[#allocation5 + $0xe0] sm:$0xff] }
  0xed   :  { %v331_v56 = vmul.f32 0.00390625, %v291_v44  ;;  %v2209_v44 = vmul.f32 0.00390625, %v292_v20  ;;  %v2217_v47 = vsub.f32 %v2026_v38, %v330_v22  ;;  %v2234_v38 = vld [vmem:[#allocation2 + $0x1e8] sm:$0xff]  ;;  %v1302_v20 = vld [vmem:[#allocation5 + $0x78] sm:$0xff] }
  0xee   :  { %v2201_v14 = vsub.f32 %v1988_v25, %v2187_v17  ;;  %v2214_v25 = vsub.f32 %v1955_v4, %v330_v22  ;;  %v2232_v4 = vsub.f32 %v1990_v26, %v351_v28  ;;  %v72_v26 = vld [vmem:[#allocation2 + $0xc8] sm:$0xff]  ;;  %1713 = vmatpush.msra.mxu3 %v1302_v20  ;;  %1456 = vmatpush.msra.mxu1 %v1302_v20  ;;  %v1299_v20 = vld [vmem:[#allocation5 + $0x60] sm:$0xff] }
  0xef   :  { %v2181_v19 = vsub.f32 %v2035_v41, %v331_v56  ;;  %v2195_v41 = vsub.f32 %v2015_v34, %v350_v60  ;;  %v2221_v48 = vsub.f32 %v1953_v3, %v2209_v44  ;;  %v570_v16 = vmul.f32 %v2217_v47, %v2217_v47 }
  0xf0   :  { %v472_v34 = vmul.f32 %v2201_v14, %v2201_v14  ;;  %v450_v60 = vmul.f32 %v2214_v25, %v2214_v25  ;;  %v471_v3 = vmul.f32 %v2232_v4, %v2232_v4 }
  0xf1   :  { %v571_v1 = vmul.f32 %v2181_v19, %v2181_v19  ;;  %v590_v49 = vmul.f32 %v2195_v41, %v2195_v41  ;;  %v452_v37 = vmul.f32 %v2221_v48, %v2221_v48 }
  0xf2   :  { %611 = vadd.xlane.f32.xlu2 %v569_v59  ;;  %491 = vadd.xlane.f32.xlu1 %v449_v43  ;;  %v2203_v30 = vpop.xlane.xlu0 %259  ;;  %v2238_v59 = vld [vmem:[#allocation2 + $0x208] sm:$0xff]  ;;  %v2243_v43 = vsub.f32 %v1944_v0, %v331_v56  ;;  %v2251_v56 = vld [vmem:[#allocation2 + $0x1f0] sm:$0xff] }
  0xf3   :  { %615 = vadd.xlane.f32.xlu0 %v571_v1 }
  0xf4   :  { %v451_v28 = vmul.f32 %v2243_v43, %v2243_v43 }
  0xfa   :  { %653 = vadd.xlane.f32.xlu2 %v590_v49  ;;  %533 = vadd.xlane.f32.xlu1 %v470_v21  ;;  %v2229_v45 = vpop.xlane.xlu0 %219  ;;  %v2253_v49 = vld [vmem:[#allocation2 + $0x1f8] sm:$0xff]  ;;  %v113_v21 = vld [vmem:[#allocation2 + $0x210] sm:$0xff] }
  0xfb   :  { %537 = vadd.xlane.f32.xlu0 %v472_v34 }
 0x102   :  { %613 = vadd.xlane.f32.xlu2 %v570_v16  ;;  %493 = vadd.xlane.f32.xlu1 %v450_v60  ;;  %v262_v1 = vpop.xlane.xlu0 %261  ;;  %v1317_v16 = vld [vmem:[#allocation5 + $0xf0] sm:$0xff] }
 0x103   :  { %497 = vadd.xlane.f32.xlu0 %v452_v37  ;;  %v314_v22 = vadd.f32 %v262_v1, %v2129_v63  ;;  %v1301_v60 = vld [vmem:[#allocation5 + $0x70] sm:$0xff]  ;;  %v1316_v37 = vld [vmem:[#allocation5 + $0xe8] sm:$0xff]  ;;  %v2261_v63 = vsub.f32 %v2033_v40, %v2187_v17  ;;  %1698 = vmatpush.msra.mxu2 %v1317_v16 }
 0x104   :  { %1714 = vmatpush.msra.mxu3 %v1301_v60  ;;  %1320 = vmatpush.msra.mxu0 %v1317_v16  ;;  %v1297_v16 = vld [vmem:[#allocation5 + $0x50] sm:$0xff] }
 0x105   :  { %v2255_v34 = vmul.f32 0.00390625, %v314_v22  ;;  %1457 = vmatpush.msra.mxu1 %v1301_v60  ;;  %1699 = vmatpush.msra.mxu2 %v1316_v37  ;;  %v592_v17 = vmul.f32 %v2261_v63, %v2261_v63  ;;  %v1314_v22 = vld [vmem:[#allocation5 + $0xd8] sm:$0xff]  ;;  %v2279_v60 = vsub.f32 %v2031_v39, %v2209_v44  ;;  %v1311_v39 = vld [vmem:[#allocation5 + $0xc0] sm:$0xff] }
 0x106   :  { %1321 = vmatpush.msra.mxu0 %v1316_v37  ;;  %v313_v37 = vadd.f32 %v2203_v30, %v2117_v11 }
 0x107   :  { %v2265_v1 = vsub.f32 %v2054_v50, %v2255_v34  ;;  %1700 = vmatpush.msra.mxu2 %v1315_v13  ;;  %v572_v30 = vmul.f32 %v2279_v60, %v2279_v60 }
 0x108   :  { %1322 = vmatpush.msra.mxu0 %v1315_v13  ;;  %v1312_v13 = vld [vmem:[#allocation5 + $0xc8] sm:$0xff]  ;;  %v353_v11 = vmul.f32 0.00390625, %v313_v37  ;;  %v293_v37 = vadd.f32 %v2229_v45, %v2061_v53 }
 0x109   :  { %2922 = vst [vmem:[#allocation28_spill] sm:$0xff] %v2265_v1  ;;  %1701 = vmatpush.msra.mxu2 %v1314_v22 }
 0x10a   :  { %535 = vadd.xlane.f32.xlu2 %v471_v3  ;;  %267 = vadd.xlane.f32.xlu1 %v2234_v38  ;;  %v222_v0 = vpop.xlane.xlu0 %221  ;;  %v1300_v3 = vld [vmem:[#allocation5 + $0x68] sm:$0xff] }
 0x10b   :  { %271 = vadd.xlane.f32.xlu0 %v2238_v59  ;;  %1715 = vmatpush.msra.mxu3 %v1300_v3 }
 0x10c   :  { %1458 = vmatpush.msra.mxu1 %v1300_v3  ;;  %1323 = vmatpush.msra.mxu0 %v1314_v22  ;;  %v1294_v22 = vld [vmem:[#allocation5 + $0x38] sm:$0xff] }
 0x10d   :  { %1716 = vmatpush.msra.mxu3 %v1299_v20 }
 0x10e   :  { %1459 = vmatpush.msra.mxu1 %v1299_v20  ;;  %v1296_v20 = vld [vmem:[#allocation5 + $0x48] sm:$0xff] }
 0x112   :  { %227 = vadd.xlane.f32.xlu1 %v2245_v35  ;;  %495 = vadd.xlane.f32.xlu2 %v451_v28  ;;  %v2268_v28 = vld [vmem:[#allocation2 + $0xb8] sm:$0xff]  ;;  %v264_v40 = vpop.xlane.xlu0 %263 }
 0x113   :  { %231 = vadd.xlane.f32.xlu0 %v72_v26  ;;  %v294_v26 = vadd.f32 %v222_v0, %v2059_v52  ;;  %v594_v52 = vmul.f32 %v2265_v1, %v2265_v1  ;;  %v1298_v0 = vld [vmem:[#allocation5 + $0x58] sm:$0xff] }
 0x114   :  { %1717 = vmatpush.msra.mxu3 %v1298_v0  ;;  %1460 = vmatpush.msra.mxu1 %v1298_v0  ;;  %v1309_v0 = vld [vmem:[#allocation5 + $0xb0] sm:$0xff] }
 0x115   :  { %v2272_v50 = vmul.f32 0.00390625, %v294_v26  ;;  %v315_v26 = vadd.f32 %v264_v40, %v2147_v12  ;;  %v1310_v40 = vld [vmem:[#allocation5 + $0xb8] sm:$0xff] }
 0x116   :  { %1718 = vmatpush.msra.mxu3 %v1297_v16  ;;  %1461 = vmatpush.msra.mxu1 %v1297_v16  ;;  %v2301_v16 = vsub.f32 %v2040_v42, %v353_v11  ;;  %v333_v42 = vmul.f32 0.00390625, %v293_v37  ;;  %v1289_v37 = vld [vmem:[#allocation5 + $0x10] sm:$0xff] }
 0x117   :  { %v2285_v3 = vsub.f32 %v2063_v54, %v2272_v50  ;;  %v1295_v54 = vld [vmem:[#allocation5 + $0x40] sm:$0xff]  ;;  %v2292_v44 = vmul.f32 0.00390625, %v315_v26  ;;  %v1293_v26 = vld [vmem:[#allocation5 + $0x30] sm:$0xff] }
 0x118   :  { %1719 = vmatpush.msra.mxu3 %v1296_v20  ;;  %1462 = vmatpush.msra.mxu1 %v1296_v20  ;;  %v593_v53 = vmul.f32 %v2301_v16, %v2301_v16 }
 0x119   :  { %2923 = vst [vmem:[#allocation29_spill] sm:$0xff] %v2285_v3  ;;  %v574_v12 = vmul.f32 %v2285_v3, %v2285_v3 }
 0x11a   :  { %189 = vadd.xlane.f32.xlu1 %v2251_v56  ;;  %269 = vadd.xlane.f32.xlu2 %v2253_v49 }
 0x11b   :  { %193 = vadd.xlane.f32.xlu0 %v113_v21  ;;  %v1313_v21 = vld [vmem:[#allocation5 + $0xd0] sm:$0xff]  ;;  %1720 = vmatpush.msra.mxu3 %v1295_v54 }
 0x11c   :  { %1702 = vmatpush.msra.mxu2 %v1313_v21  ;;  %1324 = vmatpush.msra.mxu0 %v1313_v21  ;;  %v2298_v21 = vsub.f32 %v1999_v29, %v353_v11  ;;  %v1292_v29 = vld [vmem:[#allocation5 + $0x28] sm:$0xff]  ;;  %v1291_v11 = vld [vmem:[#allocation5 + $0x20] sm:$0xff] }
 0x11d   :  { %1721 = vmatpush.msra.mxu3 %v1294_v22  ;;  %1463 = vmatpush.msra.mxu1 %v1295_v54  ;;  %v1306_v54 = vld [vmem:[#allocation5 + $0x98] sm:$0xff] }
 0x11e   :  { %1703 = vmatpush.msra.mxu2 %v1312_v13  ;;  %1325 = vmatpush.msra.mxu0 %v1312_v13  ;;  %v2307_v13 = vsub.f32 %v2013_v33, %v2292_v44  ;;  %v473_v45 = vmul.f32 %v2298_v21, %v2298_v21  ;;  %v1307_v33 = vld [vmem:[#allocation5 + $0xa0] sm:$0xff] }
 0x11f   :  { %1722 = vmatpush.msra.mxu3 %v1293_v26  ;;  %1464 = vmatpush.msra.mxu1 %v1294_v22  ;;  %v1305_v22 = vld [vmem:[#allocation5 + $0x90] sm:$0xff] }
 0x120   :  { %1704 = vmatpush.msra.mxu2 %v1311_v39  ;;  %1326 = vmatpush.msra.mxu0 %v1311_v39  ;;  %2924 = vst [vmem:[#allocation30_spill] sm:$0xff] %v2307_v13 }
 0x121   :  { %1723 = vmatpush.msra.mxu3 %v1292_v29  ;;  %1465 = vmatpush.msra.mxu1 %v1293_v26  ;;  %v1304_v26 = vld [vmem:[#allocation5 + $0x88] sm:$0xff] }
 0x122   :  { %657 = vadd.xlane.f32.xlu1 %v592_v17  ;;  %229 = vadd.xlane.f32.xlu2 %v2268_v28  ;;  %v2288_v17 = vld [vmem:[#allocation2 + $0x200] sm:$0xff] }
 0x123   :  { %661 = vadd.xlane.f32.xlu0 %v594_v52  ;;  %v224_v52 = vpop.xlane.xlu0 %223  ;;  %1705 = vmatpush.msra.mxu2 %v1310_v40 }
 0x124   :  { %v295_v20 = vadd.f32 %v224_v52, %v2057_v51  ;;  %1327 = vmatpush.msra.mxu0 %v1310_v40  ;;  %v475_v51 = vmul.f32 %v2307_v13, %v2307_v13  ;;  %v2319_v40 = vsub.f32 %v1966_v8, %v333_v42  ;;  %v2322_v52 = vsub.f32 %v2047_v46, %v333_v42 }
 0x125   :  { %1706 = vmatpush.msra.mxu2 %v1309_v0  ;;  %1724 = vmatpush.msra.mxu3 %v1291_v11  ;;  %v2336_v42 = vsub.f32 %v2008_v32, %v2255_v34 }
 0x126   :  { %1328 = vmatpush.msra.mxu0 %v1309_v0  ;;  %v2314_v39 = vmul.f32 0.00390625, %v295_v20  ;;  %1466 = vmatpush.msra.mxu1 %v1292_v29  ;;  %v573_v8 = vmul.f32 %v2322_v52, %v2322_v52  ;;  %v453_v46 = vmul.f32 %v2319_v40, %v2319_v40  ;;  %v1288_v20 = vld [vmem:[#allocation5 + $0x8] sm:$0xff]  ;;  %v1287_v29 = vld [vmem:[#allocation5] sm:$0xff] }
 0x127   :  { %2926 = vst [vmem:[#allocation32_spill] sm:$0xff] %v2336_v42 }
 0x128   :  { %v2326_v0 = vsub.f32 %v1962_v6, %v2314_v39  ;;  %1467 = vmatpush.msra.mxu1 %v1291_v11 }
 0x12a   :  { %617 = vadd.xlane.f32.xlu1 %v572_v30  ;;  %191 = vadd.xlane.f32.xlu2 %v2288_v17  ;;  %v1308_v30 = vld [vmem:[#allocation5 + $0xa8] sm:$0xff]  ;;  %2925 = vst [vmem:[#allocation31_spill] sm:$0xff] %v2326_v0  ;;  %v455_v6 = vmul.f32 %v2326_v0, %v2326_v0 }
 0x12b   :  { %621 = vadd.xlane.f32.xlu0 %v574_v12  ;;  %1707 = vmatpush.msra.mxu2 %v1308_v30  ;;  %v1290_v12 = vld [vmem:[#allocation5 + $0x18] sm:$0xff]  ;;  %v2344_v32 = vpop.xlane.xlu0 %265 }
 0x12c   :  { %1329 = vmatpush.msra.mxu0 %v1308_v30  ;;  %1725 = vmatpush.msra.mxu3 %v1290_v12  ;;  %v1303_v30 = vld [vmem:[#allocation5 + $0x80] sm:$0xff] }
 0x12d   :  { %1708 = vmatpush.msra.mxu2 %v1307_v33  ;;  %1468 = vmatpush.msra.mxu1 %v1290_v12  ;;  %v2342_v12 = vld [vmem:[#allocation2 + $0x238] sm:$0xff] }
 0x12e   :  { %1330 = vmatpush.msra.mxu0 %v1307_v33  ;;  %1726 = vmatpush.msra.mxu3 %v1289_v37  ;;  %2927 = vst [vmem:[#allocation33_spill] sm:$0xff] %v2342_v12 }
 0x12f   :  { %1709 = vmatpush.msra.mxu2 %v1306_v54  ;;  %1469 = vmatpush.msra.mxu1 %v1289_v37 }
 0x130   :  { %1331 = vmatpush.msra.mxu0 %v1306_v54  ;;  %1727 = vmatpush.msra.mxu3 %v1288_v20  ;;  %v474_v54 = vmul.f32 %v2336_v42, %v2336_v42 }
 0x131   :  { %1710 = vmatpush.msra.mxu2 %v1305_v22  ;;  %1470 = vmatpush.msra.mxu1 %v1288_v20 }
 0x132   :  { %659 = vadd.xlane.f32.xlu2 %v593_v53  ;;  %539 = vadd.xlane.f32.xlu1 %v473_v45 }
 0x133   :  { %543 = vadd.xlane.f32.xlu0 %v475_v51  ;;  %1711 = vmatpush.msra.mxu2 %v1304_v26  ;;  %v2338_v51 = vld [vmem:[#allocation2 + $0x218] sm:$0xff] }
 0x134   :  { %1332 = vmatpush.msra.mxu0 %v1305_v22  ;;  %1728 = vmatpush.msra.mxu3 %v1287_v29  ;;  %v2350_v22 = vsub.f32 %v1964_v7, %v2272_v50  ;;  %v2360_v7 = vpop.xlane.xlu0 %225 }
 0x135   :  { %1712 = vmatpush.msra.mxu2 %v1303_v30  ;;  %1471 = vmatpush.msra.mxu1 %v1287_v29 }
 0x136   :  { %1333 = vmatpush.msra.mxu0 %v1304_v26  ;;  %2928 = vst [vmem:[#allocation34_spill] sm:$0xff] %v2350_v22 }
 0x138   :  { %1334 = vmatpush.msra.mxu0 %v1303_v30  ;;  %v2356_v30 = vld [vmem:[#allocation2 + $0xf8] sm:$0xff] }
 0x139   :  { %2929 = vst [vmem:[#allocation35_spill] sm:$0xff] %v2356_v30 }
 0x13a   :  { %619 = vadd.xlane.f32.xlu2 %v573_v8  ;;  %499 = vadd.xlane.f32.xlu1 %v453_v46  ;;  %v2352_v46 = vld [vmem:[#allocation2 + $0xd8] sm:$0xff] }
 0x13b   :  { %503 = vadd.xlane.f32.xlu0 %v455_v6  ;;  %v454_v6 = vmul.f32 %v2350_v22, %v2350_v22 }
 0x13c   :  { %v648_v53 = vpop.xlane.xlu2 %647  ;;  %v528_v45 = vpop.xlane.xlu1 %527 }
 0x13d   :  { %v707_v33 = vadd.f32 %v648_v53, %v528_v45 }
 0x13f   :  { %v747_v11 = vmul.f32 0.00390625, %v707_v33 }
 0x141   :  { %v787_v34 = vadd.f32 1e-05, %v747_v11 }
 0x142   :  { %273 = vadd.xlane.f32.xlu1 %v2338_v51  ;;  %541 = vadd.xlane.f32.xlu2 %v474_v54 }
 0x143   :  { %277 = vadd.xlane.f32.xlu0 %v2342_v12  ;;  %1735 = vrsqrt.f32 %v787_v34  ;;  %vm1013_vm1 = vweird.f32 %v787_v34 }
 0x145   :  { %v608_v37 = vpop.xlane.xlu2 %607  ;;  %v488_v26 = vpop.xlane.xlu1 %487 }
 0x146   :  { %v687_v8 = vadd.f32 %v608_v37, %v488_v26  ;;  %v2362_v26 = vld [vmem:[#allocation2 + $0x220] sm:$0xff] }
 0x148   :  { %v727_v20 = vmul.f32 0.00390625, %v687_v8  ;;  %v2364_v8 = vld [vmem:[#allocation2 + $0x228] sm:$0xff] }
 0x149   :  { %v1736_v29 = vpop.eup %1735 }
 0x14a   :  { %v767_v53 = vadd.f32 1e-05, %v727_v20  ;;  %233 = vadd.xlane.f32.xlu1 %v2352_v46  ;;  %501 = vadd.xlane.f32.xlu2 %v454_v6  ;;  %v1008_v45 = vmul.f32 %v1736_v29, %v787_v34  ;;  %vm1014_vm0 = vweird.f32 %v1736_v29  ;;  %v2379_v34 = vld [vmem:[#allocation2 + $0xe8] sm:$0xff] }
 0x14b   :  { %237 = vadd.xlane.f32.xlu0 %v2356_v30  ;;  %vm1015_vm2 = vmor %vm1013_vm1, %vm1014_vm0 }
 0x14c   :  { %1737 = vrsqrt.f32 %v767_v53  ;;  %v1009_v50 = vmul.f32 %v1736_v29, %v1008_v45  ;;  %vm813_vm4 = vweird.f32 %v767_v53 }
 0x14d   :  { %v650_v33 = vpop.xlane.xlu2 %649  ;;  %v530_v11 = vpop.xlane.xlu1 %529 }
 0x14e   :  { %v708_v54 = vadd.f32 %v650_v33, %v530_v11  ;;  %v1010_v37 = vmul.f32 0.5, %v1009_v50  ;;  %v2372_v50 = vsub.f32 %v2072_v58, %v2292_v44  ;;  %v2375_v33 = vpop.xlane.xlu0 %187 }
 0x150   :  { %v748_v0 = vmul.f32 0.00390625, %v708_v54  ;;  %v1011_v20 = vsub.f32 1.5, %v1010_v37  ;;  %v595_v58 = vmul.f32 %v2372_v50, %v2372_v50 }
 0x152   :  { %v1738_v13 = vpop.eup %1737  ;;  %v2366_v6 = vadd.f32 1e-05, %v748_v0  ;;  %195 = vadd.xlane.f32.xlu1 %v2362_v26  ;;  %275 = vadd.xlane.f32.xlu2 %v2364_v8  ;;  %v1012_v45 = vmul.f32 %v1736_v29, %v1011_v20 }
 0x153   :  { %v808_v30 = vmul.f32 %v1738_v13, %v767_v53  ;;  %vm814_vm3 = vweird.f32 %v1738_v13 }
 0x154   :  { %1739 = vrsqrt.f32 %v2366_v6  ;;  %v1016_v37 = vsel %vm1015_vm2, %v1736_v29, %v1012_v45  ;;  %vm815_vm5 = vmor %vm813_vm4, %vm814_vm3  ;;  %vm1023_vm7 = vweird.f32 %v2366_v6 }
 0x155   :  { %v809_v11 = vmul.f32 %v1738_v13, %v808_v30  ;;  %v610_v54 = vpop.xlane.xlu2 %609  ;;  %v490_v0 = vpop.xlane.xlu1 %489  ;;  %v1267_v22 = vmul.f32 %v1016_v37, %v2111_v61  ;;  %v1227_v3 = vmul.f32 %v1016_v37, %v2108_v15  ;;  %v119_v61 = vld [vmem:[#allocation2 + $0x240] sm:$0xff] }
 0x156   :  { %v688_v12 = vadd.f32 %v610_v54, %v490_v0  ;;  %199 = vadd.xlane.f32.xlu0 %v119_v61 }
 0x157   :  { %v810_v20 = vmul.f32 0.5, %v809_v11  ;;  %1395 = vmatmul.f32.vlgmr.msra.gmra.mxu2 %v1267_v22  ;;  %1532 = vmatmul.f32.vlgmr.msra.gmra.mxu3 %v1227_v3  ;;  %v2389_v3 = vsub.f32 %v2081_v62, %v2314_v39  ;;  %v2398_v62 = vld [vmem:[#allocation2 + $0x230] sm:$0xff] }
 0x158   :  { %v728_v42 = vmul.f32 0.00390625, %v688_v12  ;;  %v316_v12 = vadd.f32 %v2344_v32, %v2163_v57 }
 0x159   :  { %v811_v44 = vsub.f32 1.5, %v810_v20  ;;  %v575_v57 = vmul.f32 %v2389_v3, %v2389_v3 }
 0x15a   :  { %v1740_v30 = vpop.eup %1739  ;;  %v2383_v1 = vadd.f32 1e-05, %v728_v42  ;;  %235 = vadd.xlane.f32.xlu2 %v2379_v34  ;;  %663 = vadd.xlane.f32.xlu1 %v595_v58  ;;  %v356_v39 = vmul.f32 0.00390625, %v316_v12  ;;  %v2931_v12 = vld [vmem:[#allocation14_spill] sm:$0xff] }
 0x15b   :  { %v1018_v15 = vmul.f32 %v1740_v30, %v2366_v6  ;;  %v812_v29 = vmul.f32 %v1738_v13, %v811_v44  ;;  %vm1024_vm6 = vweird.f32 %v1740_v30 }
 0x15c   :  { %1741 = vrsqrt.f32 %v2383_v1  ;;  %v2408_v61 = vsub.f32 %v2022_v36, %v356_v39  ;;  %vm1025_vm8 = vmor %vm1023_vm7, %vm1024_vm6  ;;  %v2932_v36 = vld [vmem:[#allocation26_spill] sm:$0xff]  ;;  %vm823_vm10 = vweird.f32 %v2383_v1 }
 0x15d   :  { %v1019_v42 = vmul.f32 %v1740_v30, %v1018_v15  ;;  %v652_v22 = vpop.xlane.xlu2 %651  ;;  %v532_v45 = vpop.xlane.xlu1 %531  ;;  %v816_v11 = vsel %vm815_vm5, %v1738_v13, %v812_v29  ;;  %v2930_v15 = vld [vmem:[#allocation21_spill] sm:$0xff] }
 0x15e   :  { %v709_v54 = vadd.f32 %v652_v22, %v532_v45  ;;  %v2394_v0 = vpop.xlane.xlu0 %655  ;;  %v1247_v53 = vmul.f32 %v816_v11, %v2123_v24  ;;  %v1207_v37 = vmul.f32 %v816_v11, %v2120_v18  ;;  %v2411_v29 = vsub.f32 %v2930_v15, %v356_v39 }
 0x15f   :  { %v1020_v20 = vmul.f32 0.5, %v1019_v42  ;;  %v296_v42 = vadd.f32 %v2360_v7, %v2931_v12  ;;  %v2933_v12 = vld [vmem:[#allocation11_spill] sm:$0xff] }
 0x160   :  { %v749_v58 = vmul.f32 0.00390625, %v709_v54  ;;  %1335 = vmatmul.f32.vlgmr.msra.gmra.mxu0 %v1247_v53  ;;  %1472 = vmatmul.f32.vlgmr.msra.gmra.mxu1 %v1207_v37  ;;  %v596_v7 = vmul.f32 %v2411_v29, %v2411_v29 }
 0x161   :  { %v1021_v32 = vsub.f32 1.5, %v1020_v20  ;;  %v336_v39 = vmul.f32 0.00390625, %v296_v42 }
 0x162   :  { %v1742_v13 = vpop.eup %1741  ;;  %v2402_v44 = vadd.f32 1e-05, %v749_v58  ;;  %197 = vadd.xlane.f32.xlu2 %v2398_v62  ;;  %623 = vadd.xlane.f32.xlu1 %v575_v57 }
 0x163   :  { %v818_v18 = vmul.f32 %v1742_v13, %v2383_v1  ;;  %v1022_v24 = vmul.f32 %v1740_v30, %v1021_v32  ;;  %v476_v32 = vmul.f32 %v2408_v61, %v2408_v61  ;;  %vm824_vm9 = vweird.f32 %v1742_v13 }
 0x164   :  { %1743 = vrsqrt.f32 %v2402_v44  ;;  %v2427_v42 = vsub.f32 %v2933_v12, %v336_v39  ;;  %vm825_vm11 = vmor %vm823_vm10, %vm824_vm9  ;;  %vm1033_vm13 = vweird.f32 %v2402_v44 }
 0x165   :  { %v819_v22 = vmul.f32 %v1742_v13, %v818_v18  ;;  %v612_v45 = vpop.xlane.xlu2 %611  ;;  %v492_v11 = vpop.xlane.xlu1 %491  ;;  %v1026_v54 = vsel %vm1025_vm8, %v1740_v30, %v1022_v24 }
 0x166   :  { %v689_v53 = vadd.f32 %v612_v45, %v492_v11  ;;  %v2416_v37 = vpop.xlane.xlu0 %615  ;;  %v1268_v6 = vmul.f32 %v1026_v54, %v2135_v2  ;;  %v1228_v20 = vmul.f32 %v1026_v54, %v2932_v36 }
 0x167   :  { %v820_v58 = vmul.f32 0.5, %v819_v22  ;;  %v2934_v22 = vld [vmem:[#allocation24_spill] sm:$0xff] }
 0x168   :  { %v729_v57 = vmul.f32 0.00390625, %v689_v53  ;;  %1398 = vmatmul.f32.gmra.mxu2 %v1268_v6  ;;  %1535 = vmatmul.f32.gmra.mxu3 %v1228_v20  ;;  %v2430_v45 = vsub.f32 %v2934_v22, %v336_v39 }
 0x169   :  { %v821_v18 = vsub.f32 1.5, %v820_v58 }
 0x16a   :  { %v1744_v30 = vpop.eup %1743  ;;  %v769_v24 = vadd.f32 1e-05, %v729_v57  ;;  %665 = vadd.xlane.f32.xlu2 %v596_v7  ;;  %545 = vadd.xlane.f32.xlu1 %v476_v32  ;;  %v576_v39 = vmul.f32 %v2430_v45, %v2430_v45  ;;  %v456_v32 = vmul.f32 %v2427_v42, %v2427_v42 }
 0x16b   :  { %v1028_v2 = vmul.f32 %v1744_v30, %v2402_v44  ;;  %v822_v15 = vmul.f32 %v1742_v13, %v821_v18  ;;  %vm1034_vm12 = vweird.f32 %v1744_v30 }
 0x16c   :  { %1745 = vrsqrt.f32 %v769_v24  ;;  %vm1035_vm14 = vmor %vm1033_vm13, %vm1034_vm12  ;;  %vm833_vm0 = vweird.f32 %v769_v24 }
 0x16d   :  { %v1029_v11 = vmul.f32 %v1744_v30, %v1028_v2  ;;  %v654_v54 = vpop.xlane.xlu2 %653  ;;  %v534_v53 = vpop.xlane.xlu1 %533  ;;  %v826_v6 = vsel %vm825_vm11, %v1742_v13, %v822_v15 }
 0x16e   :  { %v710_v36 = vadd.f32 %v654_v54, %v534_v53  ;;  %v2432_v20 = vpop.xlane.xlu0 %537  ;;  %v1248_v58 = vmul.f32 %v826_v6, %v2145_v27  ;;  %v1208_v57 = vmul.f32 %v826_v6, %v2142_v23 }
 0x16f   :  { %v1030_v1 = vmul.f32 0.5, %v1029_v11 }
 0x170   :  { %v750_v7 = vmul.f32 0.00390625, %v710_v36  ;;  %1338 = vmatmul.f32.gmra.mxu0 %v1248_v58  ;;  %1475 = vmatmul.f32.gmra.mxu1 %v1208_v57  ;;  %v2445_v57 = vld [vmem:[#allocation2 + $0x248] sm:$0xff] }
 0x171   :  { %v1031_v18 = vsub.f32 1.5, %v1030_v1 }
 0x172   :  { %v1746_v13 = vpop.eup %1745  ;;  %v790_v2 = vadd.f32 1e-05, %v750_v7  ;;  %625 = vadd.xlane.f32.xlu2 %v576_v39  ;;  %505 = vadd.xlane.f32.xlu1 %v456_v32 }
 0x173   :  { %v828_v15 = vmul.f32 %v1746_v13, %v769_v24  ;;  %v1032_v27 = vmul.f32 %v1744_v30, %v1031_v18  ;;  %vm834_vm15 = vweird.f32 %v1746_v13 }
 0x174   :  { %1747 = vrsqrt.f32 %v790_v2  ;;  %vm835_vm1 = vmor %vm833_vm0, %vm834_vm15  ;;  %vm1043_vm3 = vweird.f32 %v790_v2 }
 0x175   :  { %v829_v23 = vmul.f32 %v1746_v13, %v828_v15  ;;  %v614_v12 = vpop.xlane.xlu2 %613  ;;  %v494_v22 = vpop.xlane.xlu1 %493  ;;  %v1036_v11 = vsel %vm1035_vm14, %v1744_v30, %v1032_v27 }
 0x176   :  { %v690_v54 = vadd.f32 %v614_v12, %v494_v22  ;;  %v2441_v53 = vpop.xlane.xlu0 %497  ;;  %v1269_v6 = vmul.f32 %v1036_v11, %v2157_v31  ;;  %v1229_v36 = vmul.f32 %v1036_v11, %v2154_v5 }
 0x177   :  { %v830_v58 = vmul.f32 0.5, %v829_v23 }
 0x178   :  { %v730_v1 = vmul.f32 0.00390625, %v690_v54  ;;  %1401 = vmatmul.f32.gmra.mxu2 %v1269_v6  ;;  %1538 = vmatmul.f32.gmra.mxu3 %v1229_v36  ;;  %v2457_v6 = vld [vmem:[#allocation2 + $0x108] sm:$0xff] }
 0x179   :  { %v831_v44 = vsub.f32 1.5, %v830_v58 }
 0x17a   :  { %v1748_v7 = vpop.eup %1747  ;;  %v2447_v39 = vadd.f32 1e-05, %v730_v1  ;;  %279 = vadd.xlane.f32.xlu1 %v2445_v57 }
 0x17b   :  { %v1038_v30 = vmul.f32 %v1748_v7, %v790_v2  ;;  %v832_v32 = vmul.f32 %v1746_v13, %v831_v44  ;;  %vm1044_vm2 = vweird.f32 %v1748_v7 }
 0x17c   :  { %1749 = vrsqrt.f32 %v2447_v39  ;;  %vm1045_vm4 = vmor %vm1043_vm3, %vm1044_vm2  ;;  %vm843_vm6 = vweird.f32 %v2447_v39 }
 0x17d   :  { %v1039_v5 = vmul.f32 %v1748_v7, %v1038_v30  ;;  %v536_v31 = vpop.xlane.xlu2 %535  ;;  %v268_v18 = vpop.xlane.xlu1 %267  ;;  %v836_v15 = vsel %vm835_vm1, %v1746_v13, %v832_v32 }
 0x17e   :  { %v711_v27 = vadd.f32 %v2394_v0, %v536_v31  ;;  %v317_v23 = vadd.f32 %v268_v18, %v2375_v33  ;;  %v2453_v12 = vpop.xlane.xlu0 %271  ;;  %v1249_v22 = vmul.f32 %v836_v15, %v2177_v10  ;;  %v1209_v11 = vmul.f32 %v836_v15, %v2174_v55  ;;  %v2935_v0 = vld [vmem:[#allocation25_spill] sm:$0xff] }
 0x17f   :  { %v1040_v54 = vmul.f32 0.5, %v1039_v5  ;;  %v2936_v15 = vld [vmem:[#allocation13_spill] sm:$0xff] }
 0x180   :  { %v751_v24 = vmul.f32 0.00390625, %v711_v27  ;;  %v357_v36 = vmul.f32 0.00390625, %v317_v23  ;;  %1341 = vmatmul.f32.gmra.mxu0 %v1249_v22  ;;  %1478 = vmatmul.f32.gmra.mxu1 %v1209_v11 }
 0x181   :  { %v1041_v58 = vsub.f32 1.5, %v1040_v54  ;;  %v2478_v54 = vld [vmem:[#allocation2 + $0x250] sm:$0xff] }
 0x182   :  { %v1750_v13 = vpop.eup %1749  ;;  %v2459_v1 = vadd.f32 1e-05, %v751_v24  ;;  %v2462_v33 = vsub.f32 %v2935_v0, %v357_v36  ;;  %v2465_v44 = vsub.f32 %v2234_v38, %v357_v36  ;;  %239 = vadd.xlane.f32.xlu1 %v2457_v6 }
 0x183   :  { %v838_v55 = vmul.f32 %v1750_v13, %v2447_v39  ;;  %v1042_v10 = vmul.f32 %v1748_v7, %v1041_v58  ;;  %vm844_vm5 = vweird.f32 %v1750_v13 }
 0x184   :  { %1751 = vrsqrt.f32 %v2459_v1  ;;  %v597_v30 = vmul.f32 %v2465_v44, %v2465_v44  ;;  %v477_v32 = vmul.f32 %v2462_v33, %v2462_v33  ;;  %vm845_vm7 = vmor %vm843_vm6, %vm844_vm5  ;;  %vm1053_vm9 = vweird.f32 %v2459_v1 }
 0x185   :  { %v839_v5 = vmul.f32 %v1750_v13, %v838_v55  ;;  %v228_v31 = vpop.xlane.xlu1 %227  ;;  %v496_v18 = vpop.xlane.xlu2 %495  ;;  %v1046_v38 = vsel %vm1045_vm4, %v1748_v7, %v1042_v10  ;;  %v1815_v55 = vld [vmem:[#allocation2 + $0xa0] sm:$0xff] }
 0x186   :  { %v297_v27 = vadd.f32 %v228_v31, %v2936_v15  ;;  %v691_v23 = vadd.f32 %v2416_v37, %v496_v18  ;;  %667 = vadd.xlane.f32.xlu0 %v597_v30  ;;  %547 = vadd.xlane.f32.xlu2 %v477_v32  ;;  %v1270_v2 = vmul.f32 %v1046_v38, %v2195_v41  ;;  %v2480_v58 = vpop.xlane.xlu0 %231 }
 0x187   :  { %v840_v22 = vmul.f32 0.5, %v839_v5  ;;  %v1230_v11 = vmul.f32 %v1046_v38, %v2192_v9 }
 0x188   :  { %v337_v24 = vmul.f32 0.00390625, %v297_v27  ;;  %v731_v36 = vmul.f32 0.00390625, %v691_v23  ;;  %1404 = vmatmul.f32.gmra.mxu2 %v1270_v2 }
 0x189   :  { %1541 = vmatmul.f32.gmra.mxu3 %v1230_v11  ;;  %v841_v7 = vsub.f32 1.5, %v840_v22 }
 0x18a   :  { %v1752_v0 = vpop.eup %1751  ;;  %v2482_v37 = vsub.f32 %v1815_v55, %v337_v24  ;;  %v2485_v10 = vsub.f32 %v2245_v35, %v337_v24  ;;  %v2487_v41 = vadd.f32 1e-05, %v731_v36  ;;  %201 = vadd.xlane.f32.xlu1 %v2478_v54 }
 0x18b   :  { %v1048_v9 = vmul.f32 %v1752_v0, %v2459_v1  ;;  %v842_v30 = vmul.f32 %v1750_v13, %v841_v7  ;;  %vm1054_vm8 = vweird.f32 %v1752_v0  ;;  %v2938_v1 = vld [vmem:[#allocation27_spill] sm:$0xff] }
 0x18c   :  { %1753 = vrsqrt.f32 %v2487_v41  ;;  %v577_v32 = vmul.f32 %v2485_v10, %v2485_v10  ;;  %v457_v5 = vmul.f32 %v2482_v37, %v2482_v37  ;;  %vm1055_vm10 = vmor %vm1053_vm9, %vm1054_vm8  ;;  %vm853_vm12 = vweird.f32 %v2487_v41 }
 0x18d   :  { %v1049_v35 = vmul.f32 %v1752_v0, %v1048_v9  ;;  %v190_v31 = vpop.xlane.xlu1 %189  ;;  %v270_v18 = vpop.xlane.xlu2 %269  ;;  %v846_v38 = vsel %vm845_vm7, %v1750_v13, %v842_v30  ;;  %v2513_v9 = vld [vmem:[#allocation2 + $0x258] sm:$0xff] }
 0x18e   :  { %v318_v15 = vadd.f32 %v270_v18, %v190_v31  ;;  %627 = vadd.xlane.f32.xlu0 %v577_v32  ;;  %507 = vadd.xlane.f32.xlu2 %v457_v5  ;;  %v1250_v27 = vmul.f32 %v846_v38, %v2217_v47  ;;  %v1210_v39 = vmul.f32 %v846_v38, %v2214_v25  ;;  %v2505_v13 = vpop.xlane.xlu0 %193 }
 0x18f   :  { %v1050_v23 = vmul.f32 0.5, %v1049_v35  ;;  %v2937_v35 = vld [vmem:[#allocation12_spill] sm:$0xff] }
 0x190   :  { %v358_v2 = vmul.f32 0.00390625, %v318_v15  ;;  %1344 = vmatmul.f32.gmra.mxu0 %v1250_v27  ;;  %1481 = vmatmul.f32.gmra.mxu1 %v1210_v39 }
 0x191   :  { %v1051_v22 = vsub.f32 1.5, %v1050_v23 }
 0x192   :  { %v1754_v11 = vpop.eup %1753  ;;  %v2500_v24 = vsub.f32 %v2251_v56, %v358_v2  ;;  %v2503_v36 = vsub.f32 %v2253_v49, %v358_v2  ;;  %v1816_v2 = vld [vmem:[#allocation2 + $0xb0] sm:$0xff] }
 0x193   :  { %v848_v7 = vmul.f32 %v1754_v11, %v2487_v41  ;;  %v1052_v47 = vmul.f32 %v1752_v0, %v1051_v22  ;;  %vm854_vm11 = vweird.f32 %v1754_v11 }
 0x194   :  { %v598_v25 = vmul.f32 %v2503_v36, %v2503_v36  ;;  %v478_v55 = vmul.f32 %v2500_v24, %v2500_v24  ;;  %vm855_vm13 = vmor %vm853_vm12, %vm854_vm11 }
 0x195   :  { %v849_v56 = vmul.f32 %v1754_v11, %v848_v7  ;;  %v658_v30 = vpop.xlane.xlu1 %657  ;;  %v230_v49 = vpop.xlane.xlu2 %229  ;;  %v1056_v32 = vsel %vm1055_vm10, %v1752_v0, %v1052_v47 }
 0x196   :  { %v712_v5 = vadd.f32 %v658_v30, %v2432_v20  ;;  %v298_v31 = vadd.f32 %v230_v49, %v2937_v35  ;;  %669 = vadd.xlane.f32.xlu1 %v598_v25  ;;  %549 = vadd.xlane.f32.xlu0 %v478_v55  ;;  %v1271_v18 = vmul.f32 %v1056_v32, %v2938_v1  ;;  %v2526_v47 = vpop.xlane.xlu0 %661  ;;  %v2532_v55 = vld [vmem:[#allocation2 + $0x118] sm:$0xff]  ;;  %v2939_v35 = vld [vmem:[#allocation17_spill] sm:$0xff] }
 0x197   :  { %v850_v38 = vmul.f32 0.5, %v849_v56  ;;  %281 = vadd.xlane.f32.xlu2 %v2513_v9  ;;  %v1231_v15 = vmul.f32 %v1056_v32, %v2232_v4 }
 0x198   :  { %v752_v27 = vmul.f32 0.00390625, %v712_v5  ;;  %v338_v39 = vmul.f32 0.00390625, %v298_v31  ;;  %1407 = vmatmul.f32.gmra.mxu2 %v1271_v18  ;;  %v299_v31 = vadd.f32 %v2480_v58, %v2939_v35 }
 0x199   :  { %1544 = vmatmul.f32.gmra.mxu3 %v1231_v15  ;;  %v851_v23 = vsub.f32 1.5, %v850_v38  ;;  %v2544_v15 = vld [vmem:[#allocation2 + $0x268] sm:$0xff] }
 0x19a   :  { %v792_v0 = vadd.f32 1e-05, %v752_v27  ;;  %v2520_v20 = vsub.f32 %v1816_v2, %v338_v39  ;;  %v2523_v22 = vsub.f32 %v2268_v28, %v338_v39  ;;  %v2546_v27 = vld [vmem:[#allocation2 + $0x260] sm:$0xff] }
 0x19b   :  { %v852_v7 = vmul.f32 %v1754_v11, %v851_v23 }
 0x19c   :  { %1755 = vrsqrt.f32 %v792_v0  ;;  %v578_v4 = vmul.f32 %v2523_v22, %v2523_v22  ;;  %v458_v25 = vmul.f32 %v2520_v20, %v2520_v20  ;;  %vm1063_vm15 = vweird.f32 %v792_v0 }
 0x19d   :  { %v618_v56 = vpop.xlane.xlu1 %617  ;;  %v192_v30 = vpop.xlane.xlu2 %191  ;;  %v856_v49 = vsel %vm855_vm13, %v1754_v11, %v852_v7 }
 0x19e   :  { %v692_v28 = vadd.f32 %v618_v56, %v2441_v53  ;;  %v319_v32 = vadd.f32 %v2453_v12, %v192_v30  ;;  %629 = vadd.xlane.f32.xlu1 %v578_v4  ;;  %509 = vadd.xlane.f32.xlu0 %v458_v25  ;;  %v1251_v41 = vmul.f32 %v856_v49, %v2181_v19  ;;  %v339_v19 = vmul.f32 0.00390625, %v299_v31  ;;  %v2550_v2 = vpop.xlane.xlu0 %621  ;;  %v1817_v4 = vld [vmem:[#allocation2 + $0xc0] sm:$0xff] }
 0x19f   :  { %241 = vadd.xlane.f32.xlu2 %v2532_v55  ;;  %v1211_v5 = vmul.f32 %v856_v49, %v2243_v43 }
 0x1a0   :  { %v732_v1 = vmul.f32 0.00390625, %v692_v28  ;;  %v359_v18 = vmul.f32 0.00390625, %v319_v32  ;;  %1347 = vmatmul.f32.gmra.mxu0 %v1251_v41  ;;  %v2554_v25 = vsub.f32 %v1817_v4, %v339_v19  ;;  %v1818_v4 = vld [vmem:[#allocation2 + $0xc8] sm:$0xff] }
 0x1a1   :  { %1484 = vmatmul.f32.gmra.mxu1 %v1211_v5  ;;  %v2561_v5 = vld [vmem:[#allocation2 + $0x128] sm:$0xff] }
 0x1a2   :  { %v1756_v11 = vpop.eup %1755  ;;  %v772_v38 = vadd.f32 1e-05, %v732_v1  ;;  %v2542_v53 = vsub.f32 %v2288_v17, %v359_v18  ;;  %v2557_v30 = vsub.f32 %v2238_v59, %v359_v18  ;;  %v459_v31 = vmul.f32 %v2554_v25, %v2554_v25 }
 0x1a3   :  { %v1058_v12 = vmul.f32 %v1756_v11, %v792_v0  ;;  %vm1064_vm14 = vweird.f32 %v1756_v11 }
 0x1a4   :  { %1757 = vrsqrt.f32 %v772_v38  ;;  %v479_v43 = vmul.f32 %v2542_v53, %v2542_v53  ;;  %vm1065_vm0 = vmor %vm1063_vm15, %vm1064_vm14  ;;  %v599_v18 = vmul.f32 %v2557_v30, %v2557_v30  ;;  %vm863_vm2 = vweird.f32 %v772_v38 }
 0x1a5   :  { %v1059_v58 = vmul.f32 %v1756_v11, %v1058_v12  ;;  %v660_v39 = vpop.xlane.xlu2 %659  ;;  %v540_v23 = vpop.xlane.xlu1 %539 }
 0x1a6   :  { %v713_v7 = vadd.f32 %v660_v39, %v540_v23  ;;  %283 = vadd.xlane.f32.xlu0 %v2544_v15  ;;  %551 = vadd.xlane.f32.xlu1 %v479_v43 }
 0x1a7   :  { %v1060_v17 = vmul.f32 0.5, %v1059_v58  ;;  %203 = vadd.xlane.f32.xlu2 %v2546_v27 }
 0x1a8   :  { %v753_v56 = vmul.f32 0.00390625, %v713_v7  ;;  %v2571_v7 = vpop.xlane.xlu0 %543 }
 0x1a9   :  { %v1061_v49 = vsub.f32 1.5, %v1060_v17 }
 0x1aa   :  { %v1758_v28 = vpop.eup %1757  ;;  %v2559_v32 = vadd.f32 1e-05, %v753_v56  ;;  %v2573_v56 = vsub.f32 %v1818_v4, %v339_v19 }
 0x1ab   :  { %v858_v41 = vmul.f32 %v1758_v28, %v772_v38  ;;  %v1062_v35 = vmul.f32 %v1756_v11, %v1061_v49  ;;  %vm864_vm1 = vweird.f32 %v1758_v28 }
 0x1ac   :  { %1759 = vrsqrt.f32 %v2559_v32  ;;  %vm865_vm3 = vmor %vm863_vm2, %vm864_vm1  ;;  %vm1073_vm5 = vweird.f32 %v2559_v32 }
 0x1ad   :  { %v859_v1 = vmul.f32 %v1758_v28, %v858_v41  ;;  %v620_v12 = vpop.xlane.xlu2 %619  ;;  %v500_v59 = vpop.xlane.xlu1 %499  ;;  %v1066_v43 = vsel %vm1065_vm0, %v1756_v11, %v1062_v35 }
 0x1ae   :  { %v693_v58 = vadd.f32 %v620_v12, %v500_v59  ;;  %243 = vadd.xlane.f32.xlu0 %v2561_v5  ;;  %511 = vadd.xlane.f32.xlu1 %v459_v31  ;;  %v1272_v39 = vmul.f32 %v1066_v43, %v2261_v63  ;;  %v1232_v0 = vmul.f32 %v1066_v43, %v2201_v14  ;;  %v2578_v63 = vld [vmem:[#allocation2 + $0x270] sm:$0xff]  ;;  %v2580_v14 = vld [vmem:[#allocation2 + $0x278] sm:$0xff] }
 0x1af   :  { %v860_v23 = vmul.f32 0.5, %v859_v1  ;;  %671 = vadd.xlane.f32.xlu2 %v599_v18  ;;  %v579_v59 = vmul.f32 %v2573_v56, %v2573_v56 }
 0x1b0   :  { %v733_v17 = vmul.f32 0.00390625, %v693_v58  ;;  %1410 = vmatmul.f32.gmra.mxu2 %v1272_v39  ;;  %1547 = vmatmul.f32.gmra.mxu3 %v1232_v0 }
 0x1b1   :  { %v861_v49 = vsub.f32 1.5, %v860_v23 }
 0x1b2   :  { %v1760_v11 = vpop.eup %1759  ;;  %v2575_v41 = vadd.f32 1e-05, %v733_v17 }
 0x1b3   :  { %v1068_v35 = vmul.f32 %v1760_v11, %v2559_v32  ;;  %v862_v31 = vmul.f32 %v1758_v28, %v861_v49  ;;  %vm1074_vm4 = vweird.f32 %v1760_v11 }
 0x1b4   :  { %1761 = vrsqrt.f32 %v2575_v41  ;;  %vm1075_vm6 = vmor %vm1073_vm5, %vm1074_vm4  ;;  %vm873_vm8 = vweird.f32 %v2575_v41 }
 0x1b5   :  { %v1069_v1 = vmul.f32 %v1760_v11, %v1068_v35  ;;  %v274_v12 = vpop.xlane.xlu1 %273  ;;  %v542_v19 = vpop.xlane.xlu2 %541  ;;  %v866_v18 = vsel %vm865_vm3, %v1758_v28, %v862_v31 }
 0x1b6   :  { %v320_v43 = vadd.f32 %v274_v12, %v2505_v13  ;;  %v714_v58 = vadd.f32 %v2526_v47, %v542_v19  ;;  %205 = vadd.xlane.f32.xlu0 %v2578_v63  ;;  %285 = vadd.xlane.f32.xlu1 %v2580_v14  ;;  %v1252_v38 = vmul.f32 %v866_v18, %v2279_v60  ;;  %v2591_v13 = vpop.xlane.xlu0 %503  ;;  %v1819_v47 = vld [vmem:[#allocation2 + $0x210] sm:$0xff] }
 0x1b7   :  { %v1070_v39 = vmul.f32 0.5, %v1069_v1  ;;  %631 = vadd.xlane.f32.xlu2 %v579_v59  ;;  %v1212_v0 = vmul.f32 %v866_v18, %v2221_v48  ;;  %v2601_v48 = vld [vmem:[#allocation2 + $0x138] sm:$0xff] }
 0x1b8   :  { %v360_v23 = vmul.f32 0.00390625, %v320_v43  ;;  %v754_v17 = vmul.f32 0.00390625, %v714_v58  ;;  %1350 = vmatmul.f32.gmra.mxu0 %v1252_v38  ;;  %v2940_v58 = vld [vmem:[#allocation16_spill] sm:$0xff] }
 0x1b9   :  { %1487 = vmatmul.f32.gmra.mxu1 %v1212_v0  ;;  %v1071_v4 = vsub.f32 1.5, %v1070_v39 }
 0x1ba   :  { %v1762_v28 = vpop.eup %1761  ;;  %v2593_v49 = vsub.f32 %v1819_v47, %v360_v23  ;;  %v2596_v35 = vsub.f32 %v2338_v51, %v360_v23  ;;  %v2598_v60 = vadd.f32 1e-05, %v754_v17 }
 0x1bb   :  { %v868_v31 = vmul.f32 %v1762_v28, %v2575_v41  ;;  %v1072_v1 = vmul.f32 %v1760_v11, %v1071_v4  ;;  %vm874_vm7 = vweird.f32 %v1762_v28 }
 0x1bc   :  { %1763 = vrsqrt.f32 %v2598_v60  ;;  %v600_v12 = vmul.f32 %v2596_v35, %v2596_v35  ;;  %v480_v19 = vmul.f32 %v2593_v49, %v2593_v49  ;;  %vm875_vm9 = vmor %vm873_vm8, %vm874_vm7  ;;  %vm1083_vm11 = vweird.f32 %v2598_v60 }
 0x1bd   :  { %v869_v51 = vmul.f32 %v1762_v28, %v868_v31  ;;  %v234_v59 = vpop.xlane.xlu1 %233  ;;  %v502_v18 = vpop.xlane.xlu2 %501  ;;  %v1076_v43 = vsel %vm1075_vm6, %v1760_v11, %v1072_v1  ;;  %v1820_v31 = vld [vmem:[#allocation2 + $0xd0] sm:$0xff] }
 0x1be   :  { %v300_v38 = vadd.f32 %v234_v59, %v2940_v58  ;;  %v694_v39 = vadd.f32 %v2550_v2, %v502_v18  ;;  %245 = vadd.xlane.f32.xlu1 %v2601_v48  ;;  %673 = vadd.xlane.f32.xlu0 %v600_v12  ;;  %v1273_v32 = vmul.f32 %v1076_v43, %v2301_v16 }
 0x1bf   :  { %v870_v0 = vmul.f32 0.5, %v869_v51  ;;  %553 = vadd.xlane.f32.xlu2 %v480_v19  ;;  %v1233_v23 = vmul.f32 %v1076_v43, %v2298_v21  ;;  %v2621_v21 = vpop.xlane.xlu0 %277 }
 0x1c0   :  { %v340_v17 = vmul.f32 0.00390625, %v300_v38  ;;  %v734_v4 = vmul.f32 0.00390625, %v694_v39  ;;  %1413 = vmatmul.f32.gmra.mxu2 %v1273_v32 }
 0x1c1   :  { %1550 = vmatmul.f32.gmra.mxu3 %v1233_v23  ;;  %v871_v47 = vsub.f32 1.5, %v870_v0 }
 0x1c2   :  { %v1764_v11 = vpop.eup %1763  ;;  %v2614_v1 = vsub.f32 %v1820_v31, %v340_v17  ;;  %v2617_v2 = vsub.f32 %v2352_v46, %v340_v17  ;;  %v774_v12 = vadd.f32 1e-05, %v734_v4 }
 0x1c3   :  { %v1078_v16 = vmul.f32 %v1764_v11, %v2598_v60  ;;  %v872_v51 = vmul.f32 %v1762_v28, %v871_v47  ;;  %vm1084_vm10 = vweird.f32 %v1764_v11  ;;  %v2943_v60 = vld [vmem:[#allocation32_spill] sm:$0xff] }
 0x1c4   :  { %1765 = vrsqrt.f32 %v774_v12  ;;  %v580_v19 = vmul.f32 %v2617_v2, %v2617_v2  ;;  %v460_v59 = vmul.f32 %v2614_v1, %v2614_v1  ;;  %vm1085_vm12 = vmor %vm1083_vm11, %vm1084_vm10  ;;  %vm883_vm14 = vweird.f32 %v774_v12 }
 0x1c5   :  { %v1079_v18 = vmul.f32 %v1764_v11, %v1078_v16  ;;  %v196_v43 = vpop.xlane.xlu1 %195  ;;  %v276_v46 = vpop.xlane.xlu2 %275  ;;  %v876_v58 = vsel %vm875_vm9, %v1762_v28, %v872_v51 }
 0x1c6   :  { %v321_v38 = vadd.f32 %v276_v46, %v196_v43  ;;  %633 = vadd.xlane.f32.xlu0 %v580_v19  ;;  %v1253_v39 = vmul.f32 %v876_v58, %v2322_v52  ;;  %v1213_v41 = vmul.f32 %v876_v58, %v2319_v40  ;;  %v2942_v46 = vld [vmem:[#allocation28_spill] sm:$0xff] }
 0x1c7   :  { %v1080_v32 = vmul.f32 0.5, %v1079_v18  ;;  %513 = vadd.xlane.f32.xlu2 %v460_v59  ;;  %v2941_v18 = vld [vmem:[#allocation15_spill] sm:$0xff] }
 0x1c8   :  { %v361_v0 = vmul.f32 0.00390625, %v321_v38  ;;  %1353 = vmatmul.f32.gmra.mxu0 %v1253_v39  ;;  %1490 = vmatmul.f32.gmra.mxu1 %v1213_v41 }
 0x1c9   :  { %v1081_v23 = vsub.f32 1.5, %v1080_v32 }
 0x1ca   :  { %v1766_v17 = vpop.eup %1765  ;;  %v2630_v4 = vsub.f32 %v2362_v26, %v361_v0  ;;  %v2633_v47 = vsub.f32 %v2364_v8, %v361_v0  ;;  %v238_v26 = vpop.xlane.xlu0 %237  ;;  %v2944_v0 = vld [vmem:[#allocation20_spill] sm:$0xff] }
 0x1cb   :  { %v878_v28 = vmul.f32 %v1766_v17, %v774_v12  ;;  %v1082_v31 = vmul.f32 %v1764_v11, %v1081_v23  ;;  %v302_v23 = vadd.f32 %v238_v26, %v2944_v0  ;;  %vm884_vm13 = vweird.f32 %v1766_v17 }
 0x1cc   :  { %v481_v40 = vmul.f32 %v2630_v4, %v2630_v4  ;;  %v601_v52 = vmul.f32 %v2633_v47, %v2633_v47  ;;  %vm885_vm15 = vmor %vm883_vm14, %vm884_vm13 }
 0x1cd   :  { %v879_v16 = vmul.f32 %v1766_v17, %v878_v28  ;;  %v236_v51 = vpop.xlane.xlu2 %235  ;;  %v664_v19 = vpop.xlane.xlu1 %663  ;;  %v1086_v59 = vsel %vm1085_vm12, %v1764_v11, %v1082_v31  ;;  %v1821_v11 = vld [vmem:[#allocation2 + $0xe0] sm:$0xff] }
 0x1ce   :  { %v301_v43 = vadd.f32 %v236_v51, %v2941_v18  ;;  %v715_v8 = vadd.f32 %v664_v19, %v2571_v7  ;;  %555 = vadd.xlane.f32.xlu1 %v481_v40  ;;  %v1274_v58 = vmul.f32 %v1086_v59, %v2942_v46  ;;  %v1234_v38 = vmul.f32 %v1086_v59, %v2943_v60  ;;  %v2946_v46 = vld [vmem:[#allocation34_spill] sm:$0xff] }
 0x1cf   :  { %v880_v39 = vmul.f32 0.5, %v879_v16  ;;  %675 = vadd.xlane.f32.xlu2 %v601_v52  ;;  %v342_v19 = vmul.f32 0.00390625, %v302_v23  ;;  %v2669_v23 = vld [vmem:[%s2889_s2] ss:$0 sm:$0xff] }
 0x1d0   :  { %v341_v41 = vmul.f32 0.00390625, %v301_v43  ;;  %v755_v32 = vmul.f32 0.00390625, %v715_v8  ;;  %1416 = vmatmul.f32.gmra.mxu2 %v1274_v58  ;;  %1553 = vmatmul.f32.gmra.mxu3 %v1234_v38  ;;  %v2945_v8 = vld [vmem:[#allocation29_spill] sm:$0xff] }
 0x1d1   :  { %v881_v28 = vsub.f32 1.5, %v880_v39  ;;  %v1822_v39 = vld [vmem:[#allocation2 + $0xf0] sm:$0xff] }
 0x1d2   :  { %v2645_v31 = vsub.f32 %v1821_v11, %v341_v41  ;;  %v2648_v7 = vsub.f32 %v2379_v34, %v341_v41  ;;  %v795_v40 = vadd.f32 1e-05, %v755_v32  ;;  %v2658_v41 = vsub.f32 %v1822_v39, %v342_v19 }
 0x1d3   :  { %v882_v51 = vmul.f32 %v1766_v17, %v881_v28 }
 0x1d4   :  { %1767 = vrsqrt.f32 %v795_v40  ;;  %v581_v52 = vmul.f32 %v2648_v7, %v2648_v7  ;;  %v461_v16 = vmul.f32 %v2645_v31, %v2645_v31  ;;  %vm1093_vm1 = vweird.f32 %v795_v40 }
 0x1d5   :  { %v198_v59 = vpop.xlane.xlu2 %197  ;;  %v624_v26 = vpop.xlane.xlu1 %623  ;;  %v886_v18 = vsel %vm885_vm15, %v1766_v17, %v882_v51 }
 0x1d6   :  { %v322_v43 = vadd.f32 %v2621_v21, %v198_v59  ;;  %v695_v34 = vadd.f32 %v624_v26, %v2591_v13  ;;  %635 = vadd.xlane.f32.xlu1 %v581_v52  ;;  %515 = vadd.xlane.f32.xlu0 %v461_v16  ;;  %v1254_v12 = vmul.f32 %v886_v18, %v2945_v8  ;;  %v2947_v21 = vld [vmem:[#allocation33_spill] sm:$0xff] }
 0x1d7   :  { %v1214_v58 = vmul.f32 %v886_v18, %v2946_v46 }
 0x1d8   :  { %v362_v60 = vmul.f32 0.00390625, %v322_v43  ;;  %v735_v38 = vmul.f32 0.00390625, %v695_v34  ;;  %1356 = vmatmul.f32.gmra.mxu0 %v1254_v12  ;;  %v462_v43 = vmul.f32 %v2658_v41, %v2658_v41 }
 0x1d9   :  { %1493 = vmatmul.f32.gmra.mxu1 %v1214_v58 }
 0x1da   :  { %v1768_v32 = vpop.eup %1767  ;;  %v2661_v17 = vsub.f32 %v2398_v62, %v362_v60  ;;  %v2664_v0 = vsub.f32 %v2947_v21, %v362_v60  ;;  %v775_v13 = vadd.f32 1e-05, %v735_v38  ;;  %v1396_v11 = vpop.f32.mrf.mxu2  ;;  %v2948_v38 = vld [vmem:[#allocation35_spill] sm:$0xff] }
 0x1db   :  { %v1088_v28 = vmul.f32 %v1768_v32, %v795_v40  ;;  %v1533_v51 = vpop.f32.mrf.mxu3  ;;  %v2679_v39 = vsub.f32 %v2948_v38, %v342_v19  ;;  %vm1094_vm0 = vweird.f32 %v1768_v32 }
 0x1dc   :  { %1769 = vrsqrt.f32 %v775_v13  ;;  %v1534_v52 = vadd.f32 %v1533_v51, %v1396_v11  ;;  %v602_v16 = vmul.f32 %v2664_v0, %v2664_v0  ;;  %v482_v62 = vmul.f32 %v2661_v17, %v2661_v17  ;;  %vm1095_vm2 = vmor %vm1093_vm1, %vm1094_vm0 }
 0x1dd   :  { %v1089_v59 = vmul.f32 %v1768_v32, %v1088_v28  ;;  %v1336_v26 = vpop.f32.mrf.mxu0  ;;  %v1473_v18 = vpop.f32.mrf.mxu1  ;;  %vm893_vm4 = vweird.f32 %v775_v13 }
 0x1de   :  { %v1617_v34 = vadd.f32 %v2669_v23, %v1534_v52  ;;  %v1474_v8 = vadd.f32 %v1473_v18, %v1336_v26  ;;  %v666_v12 = vpop.xlane.xlu2 %665  ;;  %v546_v46 = vpop.xlane.xlu1 %545  ;;  %677 = vadd.xlane.f32.xlu0 %v602_v16  ;;  %557 = vadd.xlane.f32.xlu2 %v482_v62  ;;  %v582_v16 = vmul.f32 %v2679_v39, %v2679_v39 }
 0x1df   :  { %v1090_v58 = vmul.f32 0.5, %v1089_v59  ;;  %v716_v60 = vadd.f32 %v666_v12, %v546_v46  ;;  %517 = vadd.xlane.f32.xlu1 %v462_v43 }
 0x1e0   :  { %1657 = vst [vmem:[#allocation7 + $0xa0] sm:$0xff] %v1617_v34  ;;  %v1597_v21 = vadd.f32 %v2669_v23, %v1474_v8  ;;  %v2949_v8 = vld [vmem:[#allocation30_spill] sm:$0xff] }
 0x1e1   :  { %v756_v28 = vmul.f32 0.00390625, %v716_v60  ;;  %v1091_v11 = vsub.f32 1.5, %v1090_v58 }
 0x1e2   :  { %v1770_v51 = vpop.eup %1769  ;;  %1637 = vst [vmem:[#allocation7] sm:$0xff] %v1597_v21 }
 0x1e3   :  { %v888_v52 = vmul.f32 %v1770_v51, %v775_v13  ;;  %v796_v26 = vadd.f32 1e-05, %v756_v28  ;;  %v1092_v18 = vmul.f32 %v1768_v32, %v1091_v11  ;;  %vm894_vm3 = vweird.f32 %v1770_v51 }
 0x1e4   :  { %vm895_vm5 = vmor %vm893_vm4, %vm894_vm3 }
 0x1e5   :  { %v889_v62 = vmul.f32 %v1770_v51, %v888_v52  ;;  %1771 = vrsqrt.f32 %v796_v26  ;;  %v1096_v19 = vsel %vm1095_vm2, %v1768_v32, %v1092_v18  ;;  %vm1103_vm7 = vweird.f32 %v796_v26 }
 0x1e6   :  { %v626_v59 = vpop.xlane.xlu2 %625  ;;  %v506_v43 = vpop.xlane.xlu1 %505  ;;  %637 = vadd.xlane.f32.xlu2 %v582_v16  ;;  %v1275_v34 = vmul.f32 %v1096_v19, %v2372_v50  ;;  %v1235_v12 = vmul.f32 %v1096_v19, %v2949_v8 }
 0x1e7   :  { %v890_v46 = vmul.f32 0.5, %v889_v62  ;;  %v696_v58 = vadd.f32 %v626_v59, %v506_v43  ;;  %v200_v16 = vpop.xlane.xlu0 %199 }
 0x1e8   :  { %1419 = vmatmul.f32.gmra.mxu2 %v1275_v34  ;;  %1556 = vmatmul.f32.gmra.mxu3 %v1235_v12 }
 0x1e9   :  { %v736_v60 = vmul.f32 0.00390625, %v696_v58  ;;  %v891_v40 = vsub.f32 1.5, %v890_v46  ;;  %v2950_v58 = vld [vmem:[#allocation31_spill] sm:$0xff] }
 0x1eb   :  { %v1772_v38 = vpop.eup %1771  ;;  %v2686_v21 = vadd.f32 1e-05, %v736_v60  ;;  %v1399_v28 = vpop.f32.mrf.mxu2  ;;  %v892_v32 = vmul.f32 %v1770_v51, %v891_v40 }
 0x1ec   :  { %v1536_v11 = vpop.f32.mrf.mxu3  ;;  %v1098_v52 = vmul.f32 %v1772_v38, %v796_v26  ;;  %vm1104_vm6 = vweird.f32 %v1772_v38 }
 0x1ed   :  { %v1537_v18 = vadd.f32 %v1536_v11, %v1399_v28  ;;  %1773 = vrsqrt.f32 %v2686_v21  ;;  %v1339_v50 = vpop.f32.mrf.mxu0  ;;  %v1476_v62 = vpop.f32.mrf.mxu1  ;;  %v896_v19 = vsel %vm895_vm5, %v1770_v51, %v892_v32  ;;  %v1823_v32 = vld [vmem:[#allocation2 + $0x240] sm:$0xff]  ;;  %vm1105_vm8 = vmor %vm1103_vm7, %vm1104_vm6  ;;  %vm903_vm10 = vweird.f32 %v2686_v21 }
 0x1ee   :  { %v1099_v59 = vmul.f32 %v1772_v38, %v1098_v52  ;;  %v1477_v34 = vadd.f32 %v1476_v62, %v1339_v50  ;;  %v280_v8 = vpop.xlane.xlu1 %279  ;;  %v1255_v12 = vmul.f32 %v896_v19, %v2389_v3  ;;  %v1215_v60 = vmul.f32 %v896_v19, %v2950_v58 }
 0x1ef   :  { %v1618_v43 = vadd.f32 %v2669_v23, %v1537_v18  ;;  %v323_v46 = vadd.f32 %v280_v8, %v200_v16 }
 0x1f0   :  { %v1100_v13 = vmul.f32 0.5, %v1099_v59  ;;  %v1598_v40 = vadd.f32 %v2669_v23, %v1477_v34  ;;  %1359 = vmatmul.f32.gmra.mxu0 %v1255_v12  ;;  %1496 = vmatmul.f32.gmra.mxu1 %v1215_v60  ;;  %v2951_v34 = vld [vmem:[#allocation19_spill] sm:$0xff] }
 0x1f1   :  { %1658 = vst [vmem:[#allocation7 + $0xa8] sm:$0xff] %v1618_v43  ;;  %v363_v28 = vmul.f32 0.00390625, %v323_v46 }
 0x1f2   :  { %1638 = vst [vmem:[#allocation7 + $0x8] sm:$0xff] %v1598_v40  ;;  %v1101_v11 = vsub.f32 1.5, %v1100_v13 }
 0x1f3   :  { %v1774_v51 = vpop.eup %1773  ;;  %v2693_v52 = vsub.f32 %v1823_v32, %v363_v28  ;;  %v2696_v18 = vsub.f32 %v2445_v57, %v363_v28  ;;  %v1824_v28 = vld [vmem:[#allocation2 + $0x100] sm:$0xff] }
 0x1f4   :  { %v898_v3 = vmul.f32 %v1774_v51, %v2686_v21  ;;  %v1102_v16 = vmul.f32 %v1772_v38, %v1101_v11  ;;  %vm904_vm9 = vweird.f32 %v1774_v51 }
 0x1f5   :  { %v603_v50 = vmul.f32 %v2696_v18, %v2696_v18  ;;  %v483_v62 = vmul.f32 %v2693_v52, %v2693_v52  ;;  %vm905_vm11 = vmor %vm903_vm10, %vm904_vm9 }
 0x1f6   :  { %v899_v19 = vmul.f32 %v1774_v51, %v898_v3  ;;  %v240_v59 = vpop.xlane.xlu1 %239  ;;  %v1106_v43 = vsel %vm1105_vm8, %v1772_v38, %v1102_v16 }
 0x1f7   :  { %v303_v8 = vadd.f32 %v240_v59, %v2951_v34  ;;  %679 = vadd.xlane.f32.xlu1 %v603_v50  ;;  %559 = vadd.xlane.f32.xlu0 %v483_v62  ;;  %v1276_v57 = vmul.f32 %v1106_v43, %v2411_v29  ;;  %v1236_v12 = vmul.f32 %v1106_v43, %v2408_v61 }
 0x1f8   :  { %v900_v46 = vmul.f32 0.5, %v899_v19 }
 0x1f9   :  { %v343_v26 = vmul.f32 0.00390625, %v303_v8  ;;  %1422 = vmatmul.f32.gmra.mxu2 %v1276_v57  ;;  %1559 = vmatmul.f32.gmra.mxu3 %v1236_v12  ;;  %v548_v58 = vpop.xlane.xlu2 %547  ;;  %v668_v60 = vpop.xlane.xlu0 %667 }
 0x1fa   :  { %v717_v13 = vadd.f32 %v668_v60, %v548_v58  ;;  %v901_v40 = vsub.f32 1.5, %v900_v46 }
 0x1fb   :  { %v2706_v11 = vsub.f32 %v1824_v28, %v343_v26  ;;  %v2709_v38 = vsub.f32 %v2457_v6, %v343_v26  ;;  %v1402_v32 = vpop.f32.mrf.mxu2  ;;  %v1539_v3 = vpop.f32.mrf.mxu3 }
 0x1fc   :  { %v757_v29 = vmul.f32 0.00390625, %v717_v13  ;;  %v1540_v16 = vadd.f32 %v1539_v3, %v1402_v32  ;;  %v902_v61 = vmul.f32 %v1774_v51, %v901_v40 }
 0x1fd   :  { %v1342_v50 = vpop.f32.mrf.mxu0  ;;  %v1479_v62 = vpop.f32.mrf.mxu1  ;;  %v463_v19 = vmul.f32 %v2706_v11, %v2706_v11  ;;  %v583_v59 = vmul.f32 %v2709_v38, %v2709_v38 }
 0x1fe   :  { %v797_v43 = vadd.f32 1e-05, %v757_v29  ;;  %v1619_v6 = vadd.f32 %v2669_v23, %v1540_v16  ;;  %v1480_v34 = vadd.f32 %v1479_v62, %v1342_v50  ;;  %v906_v8 = vsel %vm905_vm11, %v1774_v51, %v902_v61  ;;  %v202_v12 = vpop.xlane.xlu1 %201 }
 0x1ff   :  { %519 = vadd.xlane.f32.xlu2 %v463_v19  ;;  %639 = vadd.xlane.f32.xlu0 %v583_v59  ;;  %v1256_v57 = vmul.f32 %v906_v8, %v2430_v45  ;;  %v1216_v21 = vmul.f32 %v906_v8, %v2427_v42 }
 0x200   :  { %1775 = vrsqrt.f32 %v797_v43  ;;  %1659 = vst [vmem:[#allocation7 + $0xb0] sm:$0xff] %v1619_v6  ;;  %v1599_v46 = vadd.f32 %v2669_v23, %v1480_v34  ;;  %vm1113_vm13 = vweird.f32 %v797_v43 }
 0x201   :  { %1362 = vmatmul.f32.gmra.mxu0 %v1256_v57  ;;  %1499 = vmatmul.f32.gmra.mxu1 %v1216_v21  ;;  %v508_v26 = vpop.xlane.xlu2 %507  ;;  %v628_v58 = vpop.xlane.xlu0 %627 }
 0x202   :  { %1639 = vst [vmem:[#allocation7 + $0x10] sm:$0xff] %v1599_v46  ;;  %v697_v60 = vadd.f32 %v628_v58, %v508_v26 }
 0x204   :  { %v737_v13 = vmul.f32 0.00390625, %v697_v60 }
 0x206   :  { %v1776_v40 = vpop.eup %1775  ;;  %v777_v51 = vadd.f32 1e-05, %v737_v13 }
 0x207   :  { %v1108_v28 = vmul.f32 %v1776_v40, %v797_v43  ;;  %vm1114_vm12 = vweird.f32 %v1776_v40 }
 0x208   :  { %1777 = vrsqrt.f32 %v777_v51  ;;  %vm1115_vm14 = vmor %vm1113_vm13, %vm1114_vm12  ;;  %vm913_vm0 = vweird.f32 %v777_v51 }
 0x209   :  { %v1109_v32 = vmul.f32 %v1776_v40, %v1108_v28  ;;  %v670_v45 = vpop.xlane.xlu1 %669  ;;  %v550_v3 = vpop.xlane.xlu0 %549 }
 0x20a   :  { %v282_v42 = vpop.xlane.xlu2 %281  ;;  %v718_v29 = vadd.f32 %v670_v45, %v550_v3 }
 0x20b   :  { %v1110_v16 = vmul.f32 0.5, %v1109_v32  ;;  %v324_v61 = vadd.f32 %v282_v42, %v202_v12  ;;  %v1405_v50 = vpop.f32.mrf.mxu2 }
 0x20c   :  { %v758_v62 = vmul.f32 0.00390625, %v718_v29  ;;  %v1542_v19 = vpop.f32.mrf.mxu3 }
 0x20d   :  { %v364_v59 = vmul.f32 0.00390625, %v324_v61  ;;  %v1543_v6 = vadd.f32 %v1542_v19, %v1405_v50  ;;  %v1345_v34 = vpop.f32.mrf.mxu0  ;;  %v1482_v8 = vpop.f32.mrf.mxu1  ;;  %v1111_v57 = vsub.f32 1.5, %v1110_v16 }
 0x20e   :  { %v1778_v21 = vpop.eup %1777  ;;  %v2720_v46 = vadd.f32 1e-05, %v758_v62  ;;  %v1483_v26 = vadd.f32 %v1482_v8, %v1345_v34  ;;  %v2952_v62 = vld [vmem:[#allocation18_spill] sm:$0xff] }
 0x20f   :  { %v908_v58 = vmul.f32 %v1778_v21, %v777_v51  ;;  %v2723_v60 = vsub.f32 %v2478_v54, %v364_v59  ;;  %v2726_v13 = vsub.f32 %v2513_v9, %v364_v59  ;;  %v1620_v12 = vadd.f32 %v2669_v23, %v1543_v6 }
 0x210   :  { %1779 = vrsqrt.f32 %v2720_v46  ;;  %v1600_v28 = vadd.f32 %v2669_v23, %v1483_v26  ;;  %v1112_v32 = vmul.f32 %v1776_v40, %v1111_v57  ;;  %vm914_vm15 = vweird.f32 %v1778_v21 }
 0x211   :  { %v909_v45 = vmul.f32 %v1778_v21, %v908_v58  ;;  %1660 = vst [vmem:[#allocation7 + $0xb8] sm:$0xff] %v1620_v12  ;;  %v630_v3 = vpop.xlane.xlu1 %629  ;;  %v510_v42 = vpop.xlane.xlu0 %509  ;;  %v604_v29 = vmul.f32 %v2726_v13, %v2726_v13  ;;  %v484_v54 = vmul.f32 %v2723_v60, %v2723_v60  ;;  %v1825_v58 = vld [vmem:[#allocation2 + $0x110] sm:$0xff]  ;;  %vm915_vm1 = vmor %vm913_vm0, %vm914_vm15  ;;  %vm1123_vm3 = vweird.f32 %v2720_v46 }
 0x212   :  { %1640 = vst [vmem:[#allocation7 + $0x18] sm:$0xff] %v1600_v28  ;;  %v242_v9 = vpop.xlane.xlu2 %241  ;;  %v698_v16 = vadd.f32 %v630_v3, %v510_v42  ;;  %v1116_v61 = vsel %vm1115_vm14, %v1776_v40, %v1112_v32 }
 0x213   :  { %v910_v50 = vmul.f32 0.5, %v909_v45  ;;  %v304_v19 = vadd.f32 %v242_v9, %v2952_v62  ;;  %681 = vadd.xlane.f32.xlu2 %v604_v29  ;;  %561 = vadd.xlane.f32.xlu1 %v484_v54  ;;  %v1277_v43 = vmul.f32 %v1116_v61, %v2465_v44  ;;  %v1237_v59 = vmul.f32 %v1116_v61, %v2462_v33 }
 0x214   :  { %v738_v6 = vmul.f32 0.00390625, %v698_v16 }
 0x215   :  { %v344_v34 = vmul.f32 0.00390625, %v304_v19  ;;  %1425 = vmatmul.f32.gmra.mxu2 %v1277_v43  ;;  %1562 = vmatmul.f32.gmra.mxu3 %v1237_v59  ;;  %v911_v8 = vsub.f32 1.5, %v910_v50 }
 0x216   :  { %v1780_v57 = vpop.eup %1779  ;;  %v2739_v26 = vadd.f32 1e-05, %v738_v6 }
 0x217   :  { %v1118_v40 = vmul.f32 %v1780_v57, %v2720_v46  ;;  %v2742_v12 = vsub.f32 %v1825_v58, %v344_v34  ;;  %v2745_v28 = vsub.f32 %v2532_v55, %v344_v34  ;;  %v912_v44 = vmul.f32 %v1778_v21, %v911_v8 }
 0x218   :  { %1781 = vrsqrt.f32 %v2739_v26  ;;  %vm1124_vm2 = vweird.f32 %v1780_v57  ;;  %vm923_vm6 = vweird.f32 %v2739_v26 }
 0x219   :  { %v1119_v33 = vmul.f32 %v1780_v57, %v1118_v40  ;;  %v552_v32 = vpop.xlane.xlu1 %551  ;;  %v284_v45 = vpop.xlane.xlu0 %283  ;;  %v584_v3 = vmul.f32 %v2745_v28, %v2745_v28  ;;  %v464_v51 = vmul.f32 %v2742_v12, %v2742_v12  ;;  %v916_v42 = vsel %vm915_vm1, %v1778_v21, %v912_v44  ;;  %vm1125_vm4 = vmor %vm1123_vm3, %vm1124_vm2 }
 0x21a   :  { %v204_v29 = vpop.xlane.xlu2 %203  ;;  %v1257_v54 = vmul.f32 %v916_v42, %v2485_v10  ;;  %v1217_v55 = vmul.f32 %v916_v42, %v2482_v37  ;;  %v2953_v42 = vld [vmem:[#allocation23_spill] sm:$0xff] }
 0x21b   :  { %v1120_v9 = vmul.f32 0.5, %v1119_v33  ;;  %v325_v16 = vadd.f32 %v284_v45, %v204_v29  ;;  %641 = vadd.xlane.f32.xlu1 %v584_v3  ;;  %521 = vadd.xlane.f32.xlu0 %v464_v51  ;;  %v1408_v61 = vpop.f32.mrf.mxu2 }
 0x21c   :  { %v1545_v50 = vpop.f32.mrf.mxu3  ;;  %1365 = vmatmul.f32.gmra.mxu0 %v1257_v54  ;;  %1502 = vmatmul.f32.gmra.mxu1 %v1217_v55 }
 0x21d   :  { %v365_v62 = vmul.f32 0.00390625, %v325_v16  ;;  %v1546_v19 = vadd.f32 %v1545_v50, %v1408_v61  ;;  %v1348_v43 = vpop.f32.mrf.mxu0  ;;  %v1121_v59 = vsub.f32 1.5, %v1120_v9 }
 0x21e   :  { %v1782_v6 = vpop.eup %1781  ;;  %v1485_v34 = vpop.f32.mrf.mxu1 }
 0x21f   :  { %v918_v21 = vmul.f32 %v1782_v6, %v2739_v26  ;;  %v2756_v10 = vsub.f32 %v2546_v27, %v365_v62  ;;  %v2759_v37 = vsub.f32 %v2544_v15, %v365_v62  ;;  %v1621_v8 = vadd.f32 %v2669_v23, %v1546_v19  ;;  %v1826_v19 = vld [vmem:[#allocation2 + $0x120] sm:$0xff] }
 0x220   :  { %v1486_v40 = vadd.f32 %v1485_v34, %v1348_v43  ;;  %v1122_v58 = vmul.f32 %v1780_v57, %v1121_v59  ;;  %vm924_vm5 = vweird.f32 %v1782_v6 }
 0x221   :  { %v919_v44 = vmul.f32 %v1782_v6, %v918_v21  ;;  %1661 = vst [vmem:[#allocation7 + $0xc0] sm:$0xff] %v1621_v8  ;;  %v512_v33 = vpop.xlane.xlu1 %511  ;;  %v244_v45 = vpop.xlane.xlu0 %243  ;;  %v605_v3 = vmul.f32 %v2759_v37, %v2759_v37  ;;  %v485_v27 = vmul.f32 %v2756_v10, %v2756_v10  ;;  %vm925_vm7 = vmor %vm923_vm6, %vm924_vm5 }
 0x222   :  { %v1601_v15 = vadd.f32 %v2669_v23, %v1486_v40  ;;  %v672_v51 = vpop.xlane.xlu2 %671  ;;  %v305_v29 = vadd.f32 %v244_v45, %v2953_v42  ;;  %v1126_v54 = vsel %vm1125_vm4, %v1780_v57, %v1122_v58 }
 0x223   :  { %v920_v55 = vmul.f32 0.5, %v919_v44  ;;  %v719_v9 = vadd.f32 %v672_v51, %v552_v32  ;;  %683 = vadd.xlane.f32.xlu0 %v605_v3  ;;  %563 = vadd.xlane.f32.xlu2 %v485_v27  ;;  %v1278_v46 = vmul.f32 %v1126_v54, %v2503_v36  ;;  %v1238_v16 = vmul.f32 %v1126_v54, %v2500_v24 }
 0x224   :  { %1641 = vst [vmem:[#allocation7 + $0x20] sm:$0xff] %v1601_v15  ;;  %v345_v61 = vmul.f32 0.00390625, %v305_v29 }
 0x225   :  { %v759_v50 = vmul.f32 0.00390625, %v719_v9  ;;  %1428 = vmatmul.f32.gmra.mxu2 %v1278_v46  ;;  %1565 = vmatmul.f32.gmra.mxu3 %v1238_v16  ;;  %v921_v62 = vsub.f32 1.5, %v920_v55  ;;  %v2954_v55 = vld [vmem:[#allocation22_spill] sm:$0xff] }
 0x226   :  { %v2771_v43 = vsub.f32 %v1826_v19, %v345_v61  ;;  %v2774_v57 = vsub.f32 %v2561_v5, %v345_v61 }
 0x227   :  { %v2776_v32 = vadd.f32 1e-05, %v759_v50  ;;  %v922_v59 = vmul.f32 %v1782_v6, %v921_v62 }
 0x228   :  { %v585_v24 = vmul.f32 %v2774_v57, %v2774_v57  ;;  %v465_v36 = vmul.f32 %v2771_v43, %v2771_v43 }
 0x229   :  { %1783 = vrsqrt.f32 %v2776_v32  ;;  %v286_v34 = vpop.xlane.xlu1 %285  ;;  %v206_v21 = vpop.xlane.xlu0 %205  ;;  %v926_v8 = vsel %vm925_vm7, %v1782_v6, %v922_v59  ;;  %vm1133_vm9 = vweird.f32 %v2776_v32 }
 0x22a   :  { %v632_v40 = vpop.xlane.xlu2 %631  ;;  %v326_v5 = vadd.f32 %v286_v34, %v206_v21  ;;  %523 = vadd.xlane.f32.xlu1 %v465_v36  ;;  %v1258_v58 = vmul.f32 %v926_v8, %v2523_v22  ;;  %v1218_v44 = vmul.f32 %v926_v8, %v2520_v20 }
 0x22b   :  { %v699_v26 = vadd.f32 %v632_v40, %v512_v33  ;;  %643 = vadd.xlane.f32.xlu2 %v585_v24  ;;  %v1827_v24 = vld [vmem:[#allocation2 + $0x130] sm:$0xff] }
 0x22c   :  { %v366_v45 = vmul.f32 0.00390625, %v326_v5  ;;  %1368 = vmatmul.f32.gmra.mxu0 %v1258_v58  ;;  %1505 = vmatmul.f32.gmra.mxu1 %v1218_v44 }
 0x22d   :  { %v739_v3 = vmul.f32 0.00390625, %v699_v26 }
 0x22e   :  { %v2787_v27 = vsub.f32 %v2578_v63, %v366_v45  ;;  %v2790_v15 = vsub.f32 %v2580_v14, %v366_v45 }
 0x22f   :  { %v1784_v6 = vpop.eup %1783  ;;  %v779_v51 = vadd.f32 1e-05, %v739_v3 }
 0x230   :  { %v1128_v42 = vmul.f32 %v1784_v6, %v2776_v32  ;;  %v606_v22 = vmul.f32 %v2790_v15, %v2790_v15  ;;  %v486_v20 = vmul.f32 %v2787_v27, %v2787_v27  ;;  %vm1134_vm8 = vweird.f32 %v1784_v6 }
 0x231   :  { %1785 = vrsqrt.f32 %v779_v51  ;;  %v246_v33 = vpop.xlane.xlu1 %245  ;;  %v674_v29 = vpop.xlane.xlu0 %673  ;;  %vm1135_vm10 = vmor %vm1133_vm9, %vm1134_vm8  ;;  %vm933_vm12 = vweird.f32 %v779_v51 }
 0x232   :  { %v1129_v54 = vmul.f32 %v1784_v6, %v1128_v42  ;;  %v306_v63 = vadd.f32 %v246_v33, %v2954_v55  ;;  %v554_v9 = vpop.xlane.xlu2 %553  ;;  %685 = vadd.xlane.f32.xlu1 %v606_v22  ;;  %565 = vadd.xlane.f32.xlu0 %v486_v20 }
 0x233   :  { %v720_v14 = vadd.f32 %v674_v29, %v554_v9  ;;  %v1411_v46 = vpop.f32.mrf.mxu2  ;;  %v1548_v16 = vpop.f32.mrf.mxu3 }
 0x234   :  { %v1130_v61 = vmul.f32 0.5, %v1129_v54  ;;  %v346_v50 = vmul.f32 0.00390625, %v306_v63  ;;  %v1549_v62 = vadd.f32 %v1548_v16, %v1411_v46 }
 0x235   :  { %v760_v19 = vmul.f32 0.00390625, %v720_v14  ;;  %v1351_v59 = vpop.f32.mrf.mxu0 }
 0x236   :  { %v2798_v36 = vsub.f32 %v1827_v24, %v346_v50  ;;  %v2801_v34 = vsub.f32 %v2601_v48, %v346_v50  ;;  %v1622_v21 = vadd.f32 %v2669_v23, %v1549_v62  ;;  %v1488_v8 = vpop.f32.mrf.mxu1  ;;  %v1131_v40 = vsub.f32 1.5, %v1130_v61 }
 0x237   :  { %v1786_v5 = vpop.eup %1785  ;;  %v2804_v58 = vadd.f32 1e-05, %v760_v19  ;;  %v1489_v44 = vadd.f32 %v1488_v8, %v1351_v59 }
 0x238   :  { %v928_v26 = vmul.f32 %v1786_v5, %v779_v51  ;;  %1662 = vst [vmem:[#allocation7 + $0xc8] sm:$0xff] %v1622_v21  ;;  %v466_v45 = vmul.f32 %v2798_v36, %v2798_v36  ;;  %v586_v3 = vmul.f32 %v2801_v34, %v2801_v34  ;;  %v1132_v48 = vmul.f32 %v1784_v6, %v1131_v40 }
 0x239   :  { %1787 = vrsqrt.f32 %v2804_v58  ;;  %v1602_v42 = vadd.f32 %v2669_v23, %v1489_v44  ;;  %v634_v22 = vpop.xlane.xlu0 %633  ;;  %vm934_vm11 = vweird.f32 %v1786_v5  ;;  %vm1143_vm15 = vweird.f32 %v2804_v58 }
 0x23a   :  { %v929_v20 = vmul.f32 %v1786_v5, %v928_v26  ;;  %v514_v33 = vpop.xlane.xlu2 %513  ;;  %525 = vadd.xlane.f32.xlu2 %v466_v45  ;;  %645 = vadd.xlane.f32.xlu0 %v586_v3  ;;  %v1136_v32 = vsel %vm1135_vm10, %v1784_v6, %v1132_v48  ;;  %vm935_vm13 = vmor %vm933_vm12, %vm934_vm11 }
 0x23b   :  { %1642 = vst [vmem:[#allocation7 + $0x28] sm:$0xff] %v1602_v42  ;;  %v700_v29 = vadd.f32 %v634_v22, %v514_v33  ;;  %v1279_v54 = vmul.f32 %v1136_v32, %v2557_v30  ;;  %v1239_v55 = vmul.f32 %v1136_v32, %v2542_v53 }
 0x23c   :  { %v930_v63 = vmul.f32 0.5, %v929_v20 }
 0x23d   :  { %v740_v9 = vmul.f32 0.00390625, %v700_v29  ;;  %1431 = vmatmul.f32.gmra.mxu2 %v1279_v54  ;;  %1568 = vmatmul.f32.gmra.mxu3 %v1239_v55 }
 0x23e   :  { %v931_v14 = vsub.f32 1.5, %v930_v63 }
 0x23f   :  { %v1788_v46 = vpop.eup %1787  ;;  %v780_v16 = vadd.f32 1e-05, %v740_v9 }
 0x240   :  { %v1138_v61 = vmul.f32 %v1788_v46, %v2804_v58  ;;  %v932_v50 = vmul.f32 %v1786_v5, %v931_v14  ;;  %vm1144_vm14 = vweird.f32 %v1788_v46 }
 0x241   :  { %1789 = vrsqrt.f32 %v780_v16  ;;  %v556_v6 = vpop.xlane.xlu1 %555  ;;  %vm1145_vm0 = vmor %vm1143_vm15, %vm1144_vm14  ;;  %vm943_vm2 = vweird.f32 %v780_v16 }
 0x242   :  { %v1139_v62 = vmul.f32 %v1788_v46, %v1138_v61  ;;  %v676_v19 = vpop.xlane.xlu2 %675  ;;  %v936_v30 = vsel %vm935_vm13, %v1786_v5, %v932_v50 }
 0x243   :  { %v721_v59 = vadd.f32 %v676_v19, %v556_v6  ;;  %v1414_v53 = vpop.f32.mrf.mxu2  ;;  %v1259_v24 = vmul.f32 %v936_v30, %v2573_v56  ;;  %v1219_v21 = vmul.f32 %v936_v30, %v2554_v25 }
 0x244   :  { %v1140_v8 = vmul.f32 0.5, %v1139_v62  ;;  %v1551_v40 = vpop.f32.mrf.mxu3 }
 0x245   :  { %v761_v44 = vmul.f32 0.00390625, %v721_v59  ;;  %v1552_v26 = vadd.f32 %v1551_v40, %v1414_v53  ;;  %1371 = vmatmul.f32.gmra.mxu0 %v1259_v24  ;;  %1508 = vmatmul.f32.gmra.mxu1 %v1219_v21  ;;  %v1354_v45 = vpop.f32.mrf.mxu0  ;;  %v1491_v51 = vpop.f32.mrf.mxu1 }
 0x246   :  { %v1492_v3 = vadd.f32 %v1491_v51, %v1354_v45  ;;  %v1141_v48 = vsub.f32 1.5, %v1140_v8 }
 0x247   :  { %v1790_v42 = vpop.eup %1789  ;;  %v801_v22 = vadd.f32 1e-05, %v761_v44  ;;  %v1623_v5 = vadd.f32 %v2669_v23, %v1552_v26 }
 0x248   :  { %v938_v20 = vmul.f32 %v1790_v42, %v780_v16  ;;  %v1603_v56 = vadd.f32 %v2669_v23, %v1492_v3  ;;  %v1142_v33 = vmul.f32 %v1788_v46, %v1141_v48  ;;  %vm944_vm1 = vweird.f32 %v1790_v42 }
 0x249   :  { %1791 = vrsqrt.f32 %v801_v22  ;;  %1663 = vst [vmem:[#allocation7 + $0xd0] sm:$0xff] %v1623_v5  ;;  %v636_v25 = vpop.xlane.xlu1 %635  ;;  %v516_v32 = vpop.xlane.xlu0 %515  ;;  %vm945_vm3 = vmor %vm943_vm2, %vm944_vm1  ;;  %vm1153_vm5 = vweird.f32 %v801_v22 }
 0x24a   :  { %v939_v29 = vmul.f32 %v1790_v42, %v938_v20  ;;  %1643 = vst [vmem:[#allocation7 + $0x30] sm:$0xff] %v1603_v56  ;;  %v701_v54 = vadd.f32 %v636_v25, %v516_v32  ;;  %v1146_v55 = vsel %vm1145_vm0, %v1788_v46, %v1142_v33 }
 0x24b   :  { %v1280_v63 = vmul.f32 %v1146_v55, %v2596_v35  ;;  %v1240_v9 = vmul.f32 %v1146_v55, %v2593_v49 }
 0x24c   :  { %v940_v14 = vmul.f32 0.5, %v939_v29  ;;  %v741_v61 = vmul.f32 0.00390625, %v701_v54 }
 0x24d   :  { %1434 = vmatmul.f32.gmra.mxu2 %v1280_v63  ;;  %1571 = vmatmul.f32.gmra.mxu3 %v1240_v9 }
 0x24e   :  { %v781_v50 = vadd.f32 1e-05, %v741_v61  ;;  %v941_v6 = vsub.f32 1.5, %v940_v14 }
 0x24f   :  { %v1792_v58 = vpop.eup %1791 }
 0x250   :  { %v1148_v62 = vmul.f32 %v1792_v58, %v801_v22  ;;  %1793 = vrsqrt.f32 %v781_v50  ;;  %v942_v19 = vmul.f32 %v1790_v42, %v941_v6  ;;  %vm1154_vm4 = vweird.f32 %v1792_v58 }
 0x251   :  { %v558_v30 = vpop.xlane.xlu2 %557  ;;  %v678_v59 = vpop.xlane.xlu0 %677  ;;  %vm1155_vm6 = vmor %vm1153_vm5, %vm1154_vm4  ;;  %vm953_vm8 = vweird.f32 %v781_v50 }
 0x252   :  { %v1149_v46 = vmul.f32 %v1792_v58, %v1148_v62  ;;  %v722_v53 = vadd.f32 %v678_v59, %v558_v30  ;;  %v946_v35 = vsel %vm945_vm3, %v1790_v42, %v942_v19  ;;  %v518_v56 = vpop.xlane.xlu1 %517 }
 0x253   :  { %v1417_v24 = vpop.f32.mrf.mxu2  ;;  %v1554_v49 = vpop.f32.mrf.mxu3  ;;  %v1260_v21 = vmul.f32 %v946_v35, %v2617_v2  ;;  %v1220_v8 = vmul.f32 %v946_v35, %v2614_v1 }
 0x254   :  { %v1150_v40 = vmul.f32 0.5, %v1149_v46  ;;  %v762_v44 = vmul.f32 0.00390625, %v722_v53  ;;  %v1555_v26 = vadd.f32 %v1554_v49, %v1417_v24 }
 0x255   :  { %1374 = vmatmul.f32.gmra.mxu0 %v1260_v21  ;;  %1511 = vmatmul.f32.gmra.mxu1 %v1220_v8  ;;  %v1357_v45 = vpop.f32.mrf.mxu0 }
 0x256   :  { %v1794_v51 = vpop.eup %1793  ;;  %v802_v16 = vadd.f32 1e-05, %v762_v44  ;;  %v1624_v3 = vadd.f32 %v2669_v23, %v1555_v26  ;;  %v1494_v48 = vpop.f32.mrf.mxu1  ;;  %v1151_v5 = vsub.f32 1.5, %v1150_v40 }
 0x257   :  { %v948_v42 = vmul.f32 %v1794_v51, %v781_v50  ;;  %v1495_v20 = vadd.f32 %v1494_v48, %v1357_v45  ;;  %vm954_vm7 = vweird.f32 %v1794_v51 }
 0x258   :  { %1795 = vrsqrt.f32 %v802_v16  ;;  %1664 = vst [vmem:[#allocation7 + $0xd8] sm:$0xff] %v1624_v3  ;;  %v1152_v2 = vmul.f32 %v1792_v58, %v1151_v5  ;;  %vm955_vm9 = vmor %vm953_vm8, %vm954_vm7  ;;  %vm1163_vm10 = vweird.f32 %v802_v16 }
 0x259   :  { %v949_v1 = vmul.f32 %v1794_v51, %v948_v42  ;;  %v1604_v33 = vadd.f32 %v2669_v23, %v1495_v20  ;;  %v638_v25 = vpop.xlane.xlu2 %637 }
 0x25a   :  { %v702_v32 = vadd.f32 %v638_v25, %v518_v56  ;;  %v1156_v29 = vsel %vm1155_vm6, %v1792_v58, %v1152_v2 }
 0x25b   :  { %v950_v54 = vmul.f32 0.5, %v949_v1  ;;  %1644 = vst [vmem:[#allocation7 + $0x38] sm:$0xff] %v1604_v33  ;;  %v1281_v55 = vmul.f32 %v1156_v29, %v2633_v47  ;;  %v1241_v63 = vmul.f32 %v1156_v29, %v2630_v4 }
 0x25c   :  { %v742_v9 = vmul.f32 0.00390625, %v702_v32 }
 0x25d   :  { %1437 = vmatmul.f32.gmra.mxu2 %v1281_v55  ;;  %1574 = vmatmul.f32.gmra.mxu3 %v1241_v63  ;;  %v951_v14 = vsub.f32 1.5, %v950_v54 }
 0x25e   :  { %v1796_v22 = vpop.eup %1795  ;;  %v782_v61 = vadd.f32 1e-05, %v742_v9 }
 0x25f   :  { %v1158_v6 = vmul.f32 %v1796_v22, %v802_v16  ;;  %v952_v62 = vmul.f32 %v1794_v51, %v951_v14  ;;  %vm1164_vm11 = vweird.f32 %v1796_v22 }
 0x260   :  { %1797 = vrsqrt.f32 %v782_v61  ;;  %vm1165_vm12 = vmor %vm1163_vm10, %vm1164_vm11  ;;  %vm963_vm14 = vweird.f32 %v782_v61 }
 0x261   :  { %v1159_v19 = vmul.f32 %v1796_v22, %v1158_v6  ;;  %v956_v58 = vsel %vm955_vm9, %v1794_v51, %v952_v62 }
 0x262   :  { %v1261_v30 = vmul.f32 %v956_v58, %v2648_v7  ;;  %v1221_v47 = vmul.f32 %v956_v58, %v2645_v31 }
 0x263   :  { %v1160_v59 = vmul.f32 0.5, %v1159_v19 }
 0x264   :  { %1377 = vmatmul.f32.gmra.mxu0 %v1261_v30  ;;  %1514 = vmatmul.f32.gmra.mxu1 %v1221_v47 }
 0x265   :  { %v1161_v4 = vsub.f32 1.5, %v1160_v59 }
 0x266   :  { %v1798_v46 = vpop.eup %1797 }
 0x267   :  { %v958_v53 = vmul.f32 %v1798_v46, %v782_v61  ;;  %v1162_v35 = vmul.f32 %v1796_v22, %v1161_v4  ;;  %vm964_vm13 = vweird.f32 %v1798_v46  ;;  %v2842_v4 = vld [vmem:[%s2889_s2] ss:$0 sm:$0xff]  ;;  %s1911_s2 = smov [#allocation7]  }
 0x268   :  { %vm965_vm15 = vmor %vm963_vm14, %vm964_vm13  ;;  %s1681_s26 = sshll.u32 %s1911_s2, 4  ;;  %s1682_s26 = int_to_ptr.vmem [resolvable:$true] %s1681_s26 }
 0x269   :  { %v959_v24 = vmul.f32 %v1798_v46, %v958_v53  ;;  %v1166_v50 = vsel %vm1165_vm12, %v1796_v22, %v1162_v35 }
 0x26a   :  { %v680_v49 = vpop.xlane.xlu1 %679  ;;  %v560_v21 = vpop.xlane.xlu0 %559  ;;  %v1282_v8 = vmul.f32 %v1166_v50, %v2664_v0  ;;  %v1242_v7 = vmul.f32 %v1166_v50, %v2661_v17 }
 0x26b   :  { %v960_v40 = vmul.f32 0.5, %v959_v24  ;;  %v723_v31 = vadd.f32 %v680_v49, %v560_v21  ;;  %v1420_v44 = vpop.f32.mrf.mxu2  ;;  %v1557_v26 = vpop.f32.mrf.mxu3 }
 0x26c   :  { %v1558_v45 = vadd.f32 %v1557_v26, %v1420_v44  ;;  %1440 = vmatmul.f32.gmra.mxu2 %v1282_v8  ;;  %1577 = vmatmul.f32.gmra.mxu3 %v1242_v7 }
 0x26d   :  { %v763_v51 = vmul.f32 0.00390625, %v723_v31  ;;  %v1360_v16 = vpop.f32.mrf.mxu0  ;;  %v961_v3 = vsub.f32 1.5, %v960_v40  ;;  %v1497_v5 = vpop.f32.mrf.mxu1 }
 0x26e   :  { %v1625_v48 = vadd.f32 %v2669_v23, %v1558_v45  ;;  %v1498_v20 = vadd.f32 %v1497_v5, %v1360_v16 }
 0x26f   :  { %v803_v42 = vadd.f32 1e-05, %v763_v51  ;;  %v962_v2 = vmul.f32 %v1798_v46, %v961_v3 }
 0x270   :  { %1665 = vst [vmem:[#allocation7 + $0xe0] sm:$0xff] %v1625_v48  ;;  %v1605_v17 = vadd.f32 %v2669_v23, %v1498_v20 }
 0x271   :  { %1799 = vrsqrt.f32 %v803_v42  ;;  %v966_v0 = vsel %vm965_vm15, %v1798_v46, %v962_v2  ;;  %vm1173_vm1 = vweird.f32 %v803_v42 }
 0x272   :  { %v520_v1 = vpop.xlane.xlu2 %519  ;;  %v640_v56 = vpop.xlane.xlu0 %639  ;;  %v1262_v33 = vmul.f32 %v966_v0, %v2679_v39  ;;  %v1222_v25 = vmul.f32 %v966_v0, %v2658_v41  ;;  %1645 = vst [vmem:[#allocation7 + $0x40] sm:$0xff] %v1605_v17 }
 0x273   :  { %v703_v32 = vadd.f32 %v640_v56, %v520_v1 }
 0x274   :  { %1380 = vmatmul.f32.gmra.mxu0 %v1262_v33  ;;  %1517 = vmatmul.f32.gmra.mxu1 %v1222_v25 }
 0x275   :  { %v743_v29 = vmul.f32 0.00390625, %v703_v32 }
 0x277   :  { %v1800_v54 = vpop.eup %1799  ;;  %v783_v55 = vadd.f32 1e-05, %v743_v29 }
 0x278   :  { %v1168_v63 = vmul.f32 %v1800_v54, %v803_v42  ;;  %vm1174_vm0 = vweird.f32 %v1800_v54 }
 0x279   :  { %1801 = vrsqrt.f32 %v783_v55  ;;  %vm1175_vm2 = vmor %vm1173_vm1, %vm1174_vm0  ;;  %vm973_vm4 = vweird.f32 %v783_v55 }
 0x27a   :  { %v1169_v9 = vmul.f32 %v1800_v54, %v1168_v63 }
 0x27c   :  { %v1170_v14 = vmul.f32 0.5, %v1169_v9  ;;  %v1423_v22 = vpop.f32.mrf.mxu2  ;;  %v1560_v61 = vpop.f32.mrf.mxu3 }
 0x27d   :  { %v1561_v6 = vadd.f32 %v1560_v61, %v1423_v22 }
 0x27e   :  { %v1363_v62 = vpop.f32.mrf.mxu0  ;;  %v1500_v19 = vpop.f32.mrf.mxu1  ;;  %v1171_v58 = vsub.f32 1.5, %v1170_v14 }
 0x27f   :  { %v1802_v39 = vpop.eup %1801  ;;  %v1626_v41 = vadd.f32 %v2669_v23, %v1561_v6  ;;  %v1501_v30 = vadd.f32 %v1500_v19, %v1363_v62 }
 0x280   :  { %v968_v47 = vmul.f32 %v1802_v39, %v783_v55  ;;  %v1172_v59 = vmul.f32 %v1800_v54, %v1171_v58  ;;  %vm974_vm3 = vweird.f32 %v1802_v39 }
 0x281   :  { %1666 = vst [vmem:[#allocation7 + $0xe8] sm:$0xff] %v1626_v41  ;;  %v1606_v46 = vadd.f32 %v2842_v4, %v1501_v30  ;;  %vm975_vm5 = vmor %vm973_vm4, %vm974_vm3 }
 0x282   :  { %v969_v53 = vmul.f32 %v1802_v39, %v968_v47  ;;  %v1176_v35 = vsel %vm1175_vm2, %v1800_v54, %v1172_v59 }
 0x283   :  { %1646 = vst [vmem:[#allocation7 + $0x48] sm:$0xff] %v1606_v46  ;;  %v1283_v24 = vmul.f32 %v1176_v35, %v2696_v18  ;;  %v1243_v23 = vmul.f32 %v1176_v35, %v2693_v52 }
 0x284   :  { %v970_v50 = vmul.f32 0.5, %v969_v53 }
 0x285   :  { %1443 = vmatmul.f32.gmra.mxu2 %v1283_v24  ;;  %1580 = vmatmul.f32.gmra.mxu3 %v1243_v23 }
 0x286   :  { %v682_v49 = vpop.xlane.xlu2 %681  ;;  %v562_v21 = vpop.xlane.xlu1 %561  ;;  %v971_v8 = vsub.f32 1.5, %v970_v50 }
 0x287   :  { %v724_v7 = vadd.f32 %v682_v49, %v562_v21 }
 0x288   :  { %v972_v40 = vmul.f32 %v1802_v39, %v971_v8 }
 0x289   :  { %v764_v31 = vmul.f32 0.00390625, %v724_v7 }
 0x28a   :  { %v976_v44 = vsel %vm975_vm5, %v1802_v39, %v972_v40 }
 0x28b   :  { %v804_v26 = vadd.f32 1e-05, %v764_v31  ;;  %v1263_v45 = vmul.f32 %v976_v44, %v2709_v38  ;;  %v1223_v18 = vmul.f32 %v976_v44, %v2706_v11 }
 0x28d   :  { %1803 = vrsqrt.f32 %v804_v26  ;;  %1383 = vmatmul.f32.gmra.mxu0 %v1263_v45  ;;  %1520 = vmatmul.f32.gmra.mxu1 %v1223_v18  ;;  %vm1183_vm7 = vweird.f32 %v804_v26 }
 0x28e   :  { %v642_v52 = vpop.xlane.xlu1 %641  ;;  %v522_v51 = vpop.xlane.xlu0 %521 }
 0x28f   :  { %v704_v16 = vadd.f32 %v642_v52, %v522_v51 }
 0x291   :  { %v744_v3 = vmul.f32 0.00390625, %v704_v16 }
 0x293   :  { %v1804_v48 = vpop.eup %1803  ;;  %v784_v5 = vadd.f32 1e-05, %v744_v3 }
 0x294   :  { %v1178_v42 = vmul.f32 %v1804_v48, %v804_v26  ;;  %vm1184_vm6 = vweird.f32 %v1804_v48 }
 0x295   :  { %1805 = vrsqrt.f32 %v784_v5  ;;  %vm1185_vm8 = vmor %vm1183_vm7, %vm1184_vm6  ;;  %vm983_vm10 = vweird.f32 %v784_v5 }
 0x296   :  { %v1179_v20 = vmul.f32 %v1804_v48, %v1178_v42  ;;  %v564_v2 = vpop.xlane.xlu2 %563  ;;  %v684_v17 = vpop.xlane.xlu0 %683 }
 0x297   :  { %v725_v0 = vadd.f32 %v684_v17, %v564_v2 }
 0x298   :  { %v1180_v1 = vmul.f32 0.5, %v1179_v20  ;;  %v1426_v56 = vpop.f32.mrf.mxu2  ;;  %v1563_v38 = vpop.f32.mrf.mxu3 }
 0x299   :  { %v765_v33 = vmul.f32 0.00390625, %v725_v0  ;;  %v1564_v11 = vadd.f32 %v1563_v38, %v1426_v56  ;;  %v1366_v25 = vpop.f32.mrf.mxu0  ;;  %v1503_v32 = vpop.f32.mrf.mxu1 }
 0x29a   :  { %v1504_v29 = vadd.f32 %v1503_v32, %v1366_v25  ;;  %v1181_v54 = vsub.f32 1.5, %v1180_v1 }
 0x29b   :  { %v1806_v55 = vpop.eup %1805  ;;  %v805_v63 = vadd.f32 1e-05, %v765_v33  ;;  %v1627_v9 = vadd.f32 %v2842_v4, %v1564_v11 }
 0x29c   :  { %v978_v14 = vmul.f32 %v1806_v55, %v784_v5  ;;  %v1607_v22 = vadd.f32 %v2842_v4, %v1504_v29  ;;  %v1182_v61 = vmul.f32 %v1804_v48, %v1181_v54  ;;  %vm984_vm9 = vweird.f32 %v1806_v55 }
 0x29d   :  { %1807 = vrsqrt.f32 %v805_v63  ;;  %1667 = vst [vmem:[#allocation7 + $0xf0] sm:$0xff] %v1627_v9  ;;  %v524_v6 = vpop.xlane.xlu1 %523  ;;  %vm985_vm11 = vmor %vm983_vm10, %vm984_vm9  ;;  %vm1193_vm13 = vweird.f32 %v805_v63 }
 0x29e   :  { %v979_v62 = vmul.f32 %v1806_v55, %v978_v14  ;;  %1647 = vst [vmem:[#allocation7 + $0x50] sm:$0xff] %v1607_v22  ;;  %v644_v19 = vpop.xlane.xlu2 %643  ;;  %v1186_v58 = vsel %vm1185_vm8, %v1804_v48, %v1182_v61 }
 0x29f   :  { %v705_v39 = vadd.f32 %v644_v19, %v524_v6  ;;  %v1284_v41 = vmul.f32 %v1186_v58, %v2726_v13  ;;  %v1244_v30 = vmul.f32 %v1186_v58, %v2723_v60 }
 0x2a0   :  { %v980_v47 = vmul.f32 0.5, %v979_v62 }
 0x2a1   :  { %v745_v59 = vmul.f32 0.00390625, %v705_v39  ;;  %1446 = vmatmul.f32.gmra.mxu2 %v1284_v41  ;;  %1583 = vmatmul.f32.gmra.mxu3 %v1244_v30 }
 0x2a2   :  { %v981_v46 = vsub.f32 1.5, %v980_v47 }
 0x2a3   :  { %v1808_v53 = vpop.eup %1807  ;;  %v785_v35 = vadd.f32 1e-05, %v745_v59 }
 0x2a4   :  { %v1188_v24 = vmul.f32 %v1808_v53, %v805_v63  ;;  %v982_v23 = vmul.f32 %v1806_v55, %v981_v46  ;;  %vm1194_vm12 = vweird.f32 %v1808_v53 }
 0x2a5   :  { %1809 = vrsqrt.f32 %v785_v35  ;;  %v686_v50 = vpop.xlane.xlu1 %685  ;;  %v566_v49 = vpop.xlane.xlu0 %565  ;;  %vm1195_vm14 = vmor %vm1193_vm13, %vm1194_vm12  ;;  %vm993_vm0 = vweird.f32 %v785_v35 }
 0x2a6   :  { %v1189_v21 = vmul.f32 %v1808_v53, %v1188_v24  ;;  %v726_v8 = vadd.f32 %v686_v50, %v566_v49  ;;  %v986_v13 = vsel %vm985_vm11, %v1806_v55, %v982_v23 }
 0x2a7   :  { %v1264_v60 = vmul.f32 %v986_v13, %v2745_v28  ;;  %v1224_v7 = vmul.f32 %v986_v13, %v2742_v12 }
 0x2a8   :  { %v1190_v40 = vmul.f32 0.5, %v1189_v21  ;;  %v766_v31 = vmul.f32 0.00390625, %v726_v8  ;;  %v1429_v44 = vpop.f32.mrf.mxu2  ;;  %v1566_v26 = vpop.f32.mrf.mxu3 }
 0x2a9   :  { %v1567_v45 = vadd.f32 %v1566_v26, %v1429_v44  ;;  %1386 = vmatmul.f32.gmra.mxu0 %v1264_v60  ;;  %1523 = vmatmul.f32.gmra.mxu1 %v1224_v7  ;;  %v1369_v18 = vpop.f32.mrf.mxu0  ;;  %v1506_v52 = vpop.f32.mrf.mxu1 }
 0x2aa   :  { %v806_v51 = vadd.f32 1e-05, %v766_v31  ;;  %v1507_v16 = vadd.f32 %v1506_v52, %v1369_v18  ;;  %v1191_v3 = vsub.f32 1.5, %v1190_v40 }
 0x2ab   :  { %v1810_v48 = vpop.eup %1809  ;;  %v1628_v5 = vadd.f32 %v2842_v4, %v1567_v45 }
 0x2ac   :  { %v988_v28 = vmul.f32 %v1810_v48, %v785_v35  ;;  %1811 = vrsqrt.f32 %v806_v51  ;;  %v1608_v12 = vadd.f32 %v2842_v4, %v1507_v16  ;;  %v1192_v42 = vmul.f32 %v1808_v53, %v1191_v3 }
 0x2ad   :  { %1668 = vst [vmem:[#allocation7 + $0xf8] sm:$0xff] %v1628_v5  ;;  %v526_v20 = vpop.xlane.xlu2 %525  ;;  %v646_v2 = vpop.xlane.xlu0 %645  ;;  %vm994_vm15 = vweird.f32 %v1810_v48  ;;  %vm1203_vm3 = vweird.f32 %v806_v51 }
 0x2ae   :  { %v989_v17 = vmul.f32 %v1810_v48, %v988_v28  ;;  %1648 = vst [vmem:[#allocation7 + $0x58] sm:$0xff] %v1608_v12  ;;  %v706_v0 = vadd.f32 %v646_v2, %v526_v20  ;;  %v1196_v1 = vsel %vm1195_vm14, %v1808_v53, %v1192_v42  ;;  %vm995_vm1 = vmor %vm993_vm0, %vm994_vm15 }
 0x2af   :  { %v1285_v56 = vmul.f32 %v1196_v1, %v2759_v37  ;;  %v1245_v38 = vmul.f32 %v1196_v1, %v2756_v10 }
 0x2b0   :  { %v990_v33 = vmul.f32 0.5, %v989_v17  ;;  %v746_v11 = vmul.f32 0.00390625, %v706_v0 }
 0x2b1   :  { %1449 = vmatmul.f32.gmra.mxu2 %v1285_v56  ;;  %1586 = vmatmul.f32.gmra.mxu3 %v1245_v38 }
 0x2b2   :  { %v1812_v25 = vpop.eup %1811  ;;  %v786_v32 = vadd.f32 1e-05, %v746_v11  ;;  %v991_v29 = vsub.f32 1.5, %v990_v33 }
 0x2b3   :  { %v1198_v54 = vmul.f32 %v1812_v25, %v806_v51  ;;  %vm1204_vm2 = vweird.f32 %v1812_v25 }
 0x2b4   :  { %1813 = vrsqrt.f32 %v786_v32  ;;  %v992_v55 = vmul.f32 %v1810_v48, %v991_v29  ;;  %vm1205_vm4 = vmor %vm1203_vm3, %vm1204_vm2  ;;  %vm1003_vm6 = vweird.f32 %v786_v32 }
 0x2b5   :  { %v1199_v63 = vmul.f32 %v1812_v25, %v1198_v54 }
 0x2b6   :  { %v996_v9 = vsel %vm995_vm1, %v1810_v48, %v992_v55 }
 0x2b7   :  { %v1200_v14 = vmul.f32 0.5, %v1199_v63  ;;  %v1265_v37 = vmul.f32 %v996_v9, %v2774_v57  ;;  %v1225_v10 = vmul.f32 %v996_v9, %v2771_v43 }
 0x2b9   :  { %1389 = vmatmul.f32.gmra.mxu0 %v1265_v37  ;;  %1526 = vmatmul.f32.gmra.mxu1 %v1225_v10  ;;  %v1201_v22 = vsub.f32 1.5, %v1200_v14 }
 0x2ba   :  { %v1814_v61 = vpop.eup %1813 }
 0x2bb   :  { %v998_v6 = vmul.f32 %v1814_v61, %v786_v32  ;;  %v1202_v62 = vmul.f32 %v1812_v25, %v1201_v22  ;;  %vm1004_vm5 = vweird.f32 %v1814_v61 }
 0x2bc   :  { %vm1005_vm7 = vmor %vm1003_vm6, %vm1004_vm5 }
 0x2bd   :  { %v999_v19 = vmul.f32 %v1814_v61, %v998_v6  ;;  %v1206_v58 = vsel %vm1205_vm4, %v1812_v25, %v1202_v62 }
 0x2be   :  { %v1286_v39 = vmul.f32 %v1206_v58, %v2790_v15  ;;  %v1246_v41 = vmul.f32 %v1206_v58, %v2787_v27 }
 0x2bf   :  { %v1000_v30 = vmul.f32 0.5, %v999_v19 }
 0x2c0   :  { %v1432_v47 = vpop.f32.mrf.mxu2  ;;  %v1569_v57 = vpop.f32.mrf.mxu3  ;;  %1452 = vmatmul.f32.gmra.mxu2 %v1286_v39  ;;  %1589 = vmatmul.f32.gmra.mxu3 %v1246_v41 }
 0x2c1   :  { %v1570_v43 = vadd.f32 %v1569_v57, %v1432_v47  ;;  %v1001_v59 = vsub.f32 1.5, %v1000_v30 }
 0x2c2   :  { %v1372_v46 = vpop.f32.mrf.mxu0  ;;  %v1509_v53 = vpop.f32.mrf.mxu1 }
 0x2c3   :  { %v1629_v35 = vadd.f32 %v2842_v4, %v1570_v43  ;;  %v1510_v24 = vadd.f32 %v1509_v53, %v1372_v46  ;;  %v1002_v23 = vmul.f32 %v1814_v61, %v1001_v59 }
 0x2c5   :  { %1669 = vst [vmem:[#allocation7 + $0x100] sm:$0xff] %v1629_v35  ;;  %v1609_v15 = vadd.f32 %v2842_v4, %v1510_v24  ;;  %v1006_v27 = vsel %vm1005_vm7, %v1814_v61, %v1002_v23 }
 0x2c6   :  { %v1266_v50 = vmul.f32 %v1006_v27, %v2801_v34  ;;  %v1226_v49 = vmul.f32 %v1006_v27, %v2798_v36 }
 0x2c7   :  { %1649 = vst [vmem:[#allocation7 + $0x60] sm:$0xff] %v1609_v15 }
 0x2c8   :  { %1392 = vmatmul.f32.gmra.mxu0 %v1266_v50  ;;  %1529 = vmatmul.f32.gmra.mxu1 %v1226_v49 }
 0x2d0   :  { %v1435_v21 = vpop.f32.mrf.mxu2  ;;  %v1572_v8 = vpop.f32.mrf.mxu3 }
 0x2d1   :  { %v1573_v13 = vadd.f32 %v1572_v8, %v1435_v21 }
 0x2d2   :  { %v1375_v60 = vpop.f32.mrf.mxu0  ;;  %v1512_v7 = vpop.f32.mrf.mxu1 }
 0x2d3   :  { %v1630_v40 = vadd.f32 %v2842_v4, %v1573_v13  ;;  %v1513_v31 = vadd.f32 %v1512_v7, %v1375_v60 }
 0x2d5   :  { %1670 = vst [vmem:[#allocation7 + $0x108] sm:$0xff] %v1630_v40  ;;  %v1610_v44 = vadd.f32 %v2842_v4, %v1513_v31 }
 0x2d7   :  { %1650 = vst [vmem:[#allocation7 + $0x68] sm:$0xff] %v1610_v44 }
 0x2e0   :  { %v1438_v26 = vpop.f32.mrf.mxu2  ;;  %v1575_v45 = vpop.f32.mrf.mxu3 }
 0x2e1   :  { %v1576_v34 = vadd.f32 %v1575_v45, %v1438_v26  ;;  %v1378_v18 = vpop.f32.mrf.mxu0  ;;  %v1515_v36 = vpop.f32.mrf.mxu1 }
 0x2e2   :  { %v1516_v52 = vadd.f32 %v1515_v36, %v1378_v18 }
 0x2e3   :  { %v1631_v51 = vadd.f32 %v2842_v4, %v1576_v34 }
 0x2e4   :  { %v1611_v16 = vadd.f32 %v2842_v4, %v1516_v52 }
 0x2e5   :  { %1671 = vst [vmem:[#allocation7 + $0x110] sm:$0xff] %v1631_v51 }
 0x2e6   :  { %1651 = vst [vmem:[#allocation7 + $0x70] sm:$0xff] %v1611_v16 }
 0x2ef   :  { %v1441_v3 = vpop.f32.mrf.mxu2  ;;  %v1578_v48 = vpop.f32.mrf.mxu3 }
 0x2f0   :  { %v1579_v5 = vadd.f32 %v1578_v48, %v1441_v3 }
 0x2f1   :  { %v1381_v28 = vpop.f32.mrf.mxu0  ;;  %v1518_v12 = vpop.f32.mrf.mxu1 }
 0x2f2   :  { %v1632_v42 = vadd.f32 %v2842_v4, %v1579_v5  ;;  %v1519_v20 = vadd.f32 %v1518_v12, %v1381_v28 }
 0x2f4   :  { %1672 = vst [vmem:[#allocation7 + $0x118] sm:$0xff] %v1632_v42  ;;  %v1612_v2 = vadd.f32 %v2842_v4, %v1519_v20 }
 0x2f6   :  { %1652 = vst [vmem:[#allocation7 + $0x78] sm:$0xff] %v1612_v2 }
 0x308   :  { %v1444_v17 = vpop.f32.mrf.mxu2  ;;  %v1581_v0 = vpop.f32.mrf.mxu3 }
 0x309   :  { %v1582_v1 = vadd.f32 %v1581_v0, %v1444_v17 }
 0x30a   :  { %v1384_v56 = vpop.f32.mrf.mxu0  ;;  %v1521_v38 = vpop.f32.mrf.mxu1 }
 0x30b   :  { %v1633_v33 = vadd.f32 %v2842_v4, %v1582_v1  ;;  %v1522_v11 = vadd.f32 %v1521_v38, %v1384_v56 }
 0x30d   :  { %1673 = vst [vmem:[#allocation7 + $0x120] sm:$0xff] %v1633_v33  ;;  %v1613_v25 = vadd.f32 %v2842_v4, %v1522_v11 }
 0x30f   :  { %1653 = vst [vmem:[#allocation7 + $0x80] sm:$0xff] %v1613_v25 }
 0x324   :  { %v1447_v32 = vpop.f32.mrf.mxu2  ;;  %v1584_v29 = vpop.f32.mrf.mxu3 }
 0x325   :  { %v1585_v54 = vadd.f32 %v1584_v29, %v1447_v32 }
 0x326   :  { %v1387_v55 = vpop.f32.mrf.mxu0  ;;  %v1524_v63 = vpop.f32.mrf.mxu1 }
 0x327   :  { %v1634_v9 = vadd.f32 %v2842_v4, %v1585_v54  ;;  %v1525_v14 = vadd.f32 %v1524_v63, %v1387_v55 }
 0x329   :  { %1674 = vst [vmem:[#allocation7 + $0x128] sm:$0xff] %v1634_v9  ;;  %v1614_v37 = vadd.f32 %v2842_v4, %v1525_v14 }
 0x32b   :  { %1654 = vst [vmem:[#allocation7 + $0x88] sm:$0xff] %v1614_v37 }
 0x334   :  { %v1450_v10 = vpop.f32.mrf.mxu2  ;;  %v1587_v22 = vpop.f32.mrf.mxu3 }
 0x335   :  { %v1588_v61 = vadd.f32 %v1587_v22, %v1450_v10 }
 0x336   :  { %v1390_v6 = vpop.f32.mrf.mxu0  ;;  %v1527_v62 = vpop.f32.mrf.mxu1 }
 0x337   :  { %v1635_v19 = vadd.f32 %v2842_v4, %v1588_v61  ;;  %v1528_v58 = vadd.f32 %v1527_v62, %v1390_v6 }
 0x339   :  { %1675 = vst [vmem:[#allocation7 + $0x130] sm:$0xff] %v1635_v19  ;;  %v1615_v39 = vadd.f32 %v2842_v4, %v1528_v58 }
 0x33b   :  { %1655 = vst [vmem:[#allocation7 + $0x90] sm:$0xff] %v1615_v39 }
 0x343   :  { %v1453_v41 = vpop.f32.mrf.mxu2  ;;  %v1590_v30 = vpop.f32.mrf.mxu3 }
 0x344   :  { %v1591_v47 = vadd.f32 %v1590_v30, %v1453_v41 }
 0x345   :  { %v1393_v57 = vpop.f32.mrf.mxu0  ;;  %v1530_v43 = vpop.f32.mrf.mxu1 }
 0x346   :  { %v1636_v59 = vadd.f32 %v2842_v4, %v1591_v47  ;;  %v1531_v46 = vadd.f32 %v1530_v43, %v1393_v57 }
 0x348   :  { %1676 = vst [vmem:[#allocation7 + $0x138] sm:$0xff] %v1636_v59  ;;  %v1616_v53 = vadd.f32 %v2842_v4, %v1531_v46 }
 0x34a   :  { %1656 = vst [vmem:[#allocation7 + $0x98] sm:$0xff] %v1616_v53 }
 0x34b   :  { %1689 = dma.vmem_to_hbm [thread:$0]  %s1682_s26, 5120, %s1684_s29, [#allocation4], %s1908_s20, %s1908_s20, %s1909_s21  }
 0x34c   :  { %1905 = dma.done.wait [#allocation4], 5120  }
 0x34d   :  { %1906 = vsyncadd [#allocation4], 4294962176 }
 0x34e   :  { %1694 = vsyncpa [#allocation3], 1 }
 0x34f   :  { %1695 = vsyncpa [#allocation6], 1 }
 0x350   :  { %1696 = vsyncpa [#allocation4], 1 }

</bundles_post_ra>
